<compile_context>
chip_gen: v6e
topology: v6e:2x2x1
jax: 0.10.0
libtpu: 0.0.40
codegen_flags: <defaults>
</compile_context>

<pallas_src>
import jax
import jax.numpy as jnp
from jax import lax
from jax.experimental import pallas as pl
from jax.experimental.pallas import tpu as pltpu

L = 16        # sequence length (power of two, divisible by 4)
IN_CH = 4     # input channels
FEAT = 128    # feature extractor output channels (hard-coded in CNN1D)
HIDDEN = 1024
OUT = 8       # classifier output size (number of classes)


def _round_up(x, m):
    return (x + m - 1) // m * m


def _make_kernel(TB, Lseq):
    """Build the fused forward kernel for a batch tile of TB samples."""
    Q = Lseq // 4                       # positions left per sample at avg-pool

    def conv3_relu(col_ref, h, w_ref, b_ref, Lcur):
        """3-tap, padding=1, stride-1 conv + ReLU as ONE im2col matmul.

        h: (N, C) value with rows ordered (sample-major, position-minor).
        col_ref: (N, 3*C) VMEM scratch used to build the shifted windows.
        """
        N, C = h.shape
        # tap k reads input position (l + k - 1); the +-1 row shift is done via
        # ref addressing (no value-level concat / reshape / roll needed).
        col_ref[1:N, 0:C] = h[0:N - 1, :]            # tap 0 -> input[l-1]
        col_ref[:, C:2 * C] = h                      # tap 1 -> input[l]
        col_ref[0:N - 1, 2 * C:3 * C] = h[1:N, :]    # tap 2 -> input[l+1]
        cols = col_ref[...]
        # Zero the taps that cross a sample boundary (per-sample zero padding).
        # Rows with l == 0 must not see tap 0, rows with l == Lcur-1 must not
        # see tap 2.  This also covers the never-written first/last scratch
        # rows, so no pre-zeroing of the scratch is required.
        l = lax.broadcasted_iota(jnp.int32, (N, 3 * C), 0) & (Lcur - 1)
        c = lax.broadcasted_iota(jnp.int32, (N, 3 * C), 1)
        invalid = ((l == 0) & (c < C)) | ((l == Lcur - 1) & (c >= 2 * C))
        cols = jnp.where(invalid, 0.0, cols)
        out = jnp.dot(cols, w_ref[...], preferred_element_type=jnp.float32)
        return jnp.maximum(out + b_ref[...], 0.0)

    def maxpool2(mp_ref, h):
        """MaxPool1d(kernel=2, stride=2) via even/odd strided ref reads."""
        N = h.shape[0]
        half = N // 2
        mp_ref[...] = h
        return jnp.maximum(mp_ref[pl.ds(0, half, stride=2), :],
                           mp_ref[pl.ds(1, half, stride=2), :])

    def kernel(x_ref, w1_ref, b1_ref, w2_ref, b2_ref, w3_ref, b3_ref,
               w4_ref, b4_ref, fc1w_ref, fc1b_ref, fc2w_ref, fc2b_ref,
               o_ref, col2, col3, col4, mp1, mp2, avg):
        # conv1 (k=5, pad=2): im2col was done once in the wrapper, so this is a
        # single (TB*L, 5*Cin) @ (5*Cin, 32) matmul.
        h1 = jnp.maximum(
            jnp.dot(x_ref[...], w1_ref[...],
                    preferred_element_type=jnp.float32) + b1_ref[...], 0.0)
        h2 = conv3_relu(col2, h1, w2_ref, b2_ref, Lseq)            # (TB*L,   32)
        h2p = maxpool2(mp1, h2)                                    # (TB*L/2, 32)
        h3 = conv3_relu(col3, h2p, w3_ref, b3_ref, Lseq // 2)      # (TB*L/2, 64)
        h3p = maxpool2(mp2, h3)                                    # (TB*L/4, 64)
        h4 = conv3_relu(col4, h3p, w4_ref, b4_ref, Lseq // 4)      # (TB*L/4, 128)

        # AdaptiveAvgPool1d(1): mean of the Q remaining positions per sample.
        avg[...] = h4
        feat = avg[pl.ds(0, TB, stride=Q), :]
        for r in range(1, Q):                                      # static unroll
            feat = feat + avg[pl.ds(r, TB, stride=Q), :]
        feat = feat * (1.0 / Q)                                    # (TB, 128)

        # classifier (dropout_prob == 0.0 -> dropout branch never taken)
        hid = jnp.maximum(
            jnp.dot(feat, fc1w_ref[...],
                    preferred_element_type=jnp.float32) + fc1b_ref[...], 0.0)
        logits = jnp.dot(hid, fc2w_ref[...],
                         preferred_element_type=jnp.float32) + fc2b_ref[...]
        o_ref[...] = logits.astype(o_ref.dtype)                    # (TB, OUT_pad)

    return kernel


def cnn1d_forward(x_ncl, params, tb=128):
    """x_ncl: (B, IN_CH, L) float32, PyTorch NCL layout. Returns (B, OUT) logits."""
    (w1, b1, w2, b2, w3, b3, w4, b4, fc1w, fc1b, fc2w, fc2b) = params
    B, cin, lseq = x_ncl.shape
    assert cin == IN_CH and lseq == L
    assert L % 4 == 0 and (L & (L - 1)) == 0

    # ------- plain-JAX layout glue: transposes + conv1 im2col + padding -------
    x_blc = jnp.transpose(x_ncl, (0, 2, 1)).astype(jnp.float32)        # (B, L, Cin)
    xpad = jnp.pad(x_blc, ((0, 0), (2, 2), (0, 0)))                    # conv1 pad=2
    x_col = jnp.concatenate([xpad[:, k:k + L, :] for k in range(5)],
                            axis=-1)                                   # (B, L, 5*Cin)

    TB = min(_round_up(tb, 8), _round_up(B, 8))     # batch tile (multiple of 8)
    Bp = _round_up(B, TB)
    if Bp != B:
        x_col = jnp.pad(x_col, ((0, Bp - B), (0, 0), (0, 0)))
    x2d = x_col.reshape(Bp * L, 5 * IN_CH)          # rows ordered b*L + l

    cw = lambda w: jnp.transpose(w, (2, 1, 0)).reshape(-1, w.shape[0])  # (K*Cin,Cout)
    rb = lambda b: b.reshape(1, -1)
    out_dim = fc2w.shape[0]
    out_pad = _round_up(out_dim, 128)               # lane-dense output block
    fc2w_p = jnp.pad(fc2w.T, ((0, 0), (0, out_pad - out_dim)))
    fc2b_p = jnp.pad(rb(fc2b), ((0, 0), (0, out_pad - out_dim)))

    args = (x2d, cw(w1), rb(b1), cw(w2), rb(b2), cw(w3), rb(b3),
            cw(w4), rb(b4), fc1w.T, rb(fc1b), fc2w_p, fc2b_p)

    resident = lambda a: pl.BlockSpec(a.shape, lambda i: (0, 0))  # weights/biases
    in_specs = [pl.BlockSpec((TB * L, 5 * IN_CH), lambda i: (i, 0))]
    in_specs += [resident(a) for a in args[1:]]
    out_spec = pl.BlockSpec((TB, out_pad), lambda i: (i, 0))

    scratch = [
        pltpu.VMEM((TB * L, 3 * 32), jnp.float32),        # conv2 im2col
        pltpu.VMEM((TB * L // 2, 3 * 32), jnp.float32),   # conv3 im2col
        pltpu.VMEM((TB * L // 4, 3 * 64), jnp.float32),   # conv4 im2col
        pltpu.VMEM((TB * L, 32), jnp.float32),            # maxpool1 staging
        pltpu.VMEM((TB * L // 2, 64), jnp.float32),       # maxpool2 staging
        pltpu.VMEM((TB * L // 4, FEAT), jnp.float32),     # avg-pool staging
    ]

    out = pl.pallas_call(
        _make_kernel(TB, L),
        out_shape=jax.ShapeDtypeStruct((Bp, out_pad), jnp.float32),
        grid_spec=pltpu.PrefetchScalarGridSpec(
            num_scalar_prefetch=0,
            grid=(Bp // TB,),
            in_specs=in_specs,
            out_specs=out_spec,
            scratch_shapes=scratch),
        compiler_params=pltpu.CompilerParams(
            dimension_semantics=("parallel",),
            vmem_limit_bytes=32 * 1024 * 1024),
    )(*args)
    return out[:B, :out_dim]


def reference_forward(x_ncl, params):
    """Pure-JAX reference mirroring the PyTorch module (NCL layout)."""
    (w1, b1, w2, b2, w3, b3, w4, b4, fc1w, fc1b, fc2w, fc2b) = params

    def conv(x, w, b, pad):
        y = lax.conv_general_dilated(x, w, window_strides=(1,),
                                     padding=[(pad, pad)],
                                     dimension_numbers=('NCH', 'OIH', 'NCH'))
        return jax.nn.relu(y + b[None, :, None])

    def maxpool(x):
        bsz, c, ln = x.shape
        return jnp.max(x.reshape(bsz, c, ln // 2, 2), axis=-1)

    h = conv(x_ncl, w1, b1, 2)
    h = conv(h, w2, b2, 1)
    h = maxpool(h)
    h = conv(h, w3, b3, 1)
    h = maxpool(h)
    h = conv(h, w4, b4, 1)
    feat = jnp.mean(h, axis=-1)                    # AdaptiveAvgPool1d(1) + view
    hid = jax.nn.relu(feat @ fc1w.T + fc1b)
    return hid @ fc2w.T + fc2b


if __name__ == "__main__":
    key = jax.random.PRNGKey(0)
    keys = jax.random.split(key, 13)

    def init(k, shape, scale=0.1):
        return jax.random.normal(k, shape, jnp.float32) * scale

    # parameters in PyTorch shapes: Conv1d weight (Cout, Cin, K), Linear (out, in)
    params = (
        init(keys[0], (32, IN_CH, 5)),   init(keys[1], (32,)),
        init(keys[2], (32, 32, 3)),      init(keys[3], (32,)),
        init(keys[4], (64, 32, 3)),      init(keys[5], (64,)),
        init(keys[6], (FEAT, 64, 3)),    init(keys[7], (FEAT,)),
        init(keys[8], (HIDDEN, FEAT)),   init(keys[9], (HIDDEN,)),
        init(keys[10], (OUT, HIDDEN)),   init(keys[11], (OUT,)),
    )

    B = 20
    x = jax.random.normal(keys[12], (B, IN_CH, L), jnp.float32)   # (B, C, L)

    # small batch tile so the multi-step grid + batch padding paths are exercised
    logits = jax.block_until_ready(cnn1d_forward(x, params, tb=8))
    ref = jax.block_until_ready(reference_forward(x, params))

    assert logits.shape == (B, OUT), logits.shape
    assert jnp.allclose(logits, ref, atol=1e-3, rtol=1e-3), (
        "mismatch vs reference", logits, ref)
    print("KERNEL_OK")
</pallas_src>

<mosaic_0001>
module attributes {stable_mosaic.version = 11 : i64} {
  func.func @kernel(%arg0: i32, %arg1: memref<128x20xf32, #tpu.memory_space<vmem>>, %arg2: memref<20x32xf32, #tpu.memory_space<vmem>>, %arg3: memref<1x32xf32, #tpu.memory_space<vmem>>, %arg4: memref<96x32xf32, #tpu.memory_space<vmem>>, %arg5: memref<1x32xf32, #tpu.memory_space<vmem>>, %arg6: memref<96x64xf32, #tpu.memory_space<vmem>>, %arg7: memref<1x64xf32, #tpu.memory_space<vmem>>, %arg8: memref<192x128xf32, #tpu.memory_space<vmem>>, %arg9: memref<1x128xf32, #tpu.memory_space<vmem>>, %arg10: memref<128x1024xf32, #tpu.memory_space<vmem>>, %arg11: memref<1x1024xf32, #tpu.memory_space<vmem>>, %arg12: memref<1024x128xf32, #tpu.memory_space<vmem>>, %arg13: memref<1x128xf32, #tpu.memory_space<vmem>>, %arg14: memref<8x128xf32, #tpu.memory_space<vmem>>, %arg15: memref<128x96xf32, #tpu.memory_space<vmem>>, %arg16: memref<64x96xf32, #tpu.memory_space<vmem>>, %arg17: memref<32x192xf32, #tpu.memory_space<vmem>>, %arg18: memref<128x32xf32, #tpu.memory_space<vmem>>, %arg19: memref<64x64xf32, #tpu.memory_space<vmem>>, %arg20: memref<32x128xf32, #tpu.memory_space<vmem>>) attributes {dimension_semantics = [#tpu.dimension_semantics<parallel>], iteration_bounds = array<i64: 3>, scalar_prefetch = 0 : i64, scratch_operands = 6 : i64, tpu.core_type = #tpu.core_type<tc>, window_params = [{transform_indices = @transform_0, window_bounds = array<i64: 128, 20>}, {pipeline_mode = #tpu.pipeline_mode<synchronous>, transform_indices = @transform_1, window_bounds = array<i64: 20, 32>}, {pipeline_mode = #tpu.pipeline_mode<synchronous>, transform_indices = @transform_2, window_bounds = array<i64: 1, 32>}, {pipeline_mode = #tpu.pipeline_mode<synchronous>, transform_indices = @transform_3, window_bounds = array<i64: 96, 32>}, {pipeline_mode = #tpu.pipeline_mode<synchronous>, transform_indices = @transform_4, window_bounds = array<i64: 1, 32>}, {pipeline_mode = #tpu.pipeline_mode<synchronous>, transform_indices = @transform_5, window_bounds = array<i64: 96, 64>}, {pipeline_mode = #tpu.pipeline_mode<synchronous>, transform_indices = @transform_6, window_bounds = array<i64: 1, 64>}, {pipeline_mode = #tpu.pipeline_mode<synchronous>, transform_indices = @transform_7, window_bounds = array<i64: 192, 128>}, {pipeline_mode = #tpu.pipeline_mode<synchronous>, transform_indices = @transform_8, window_bounds = array<i64: 1, 128>}, {pipeline_mode = #tpu.pipeline_mode<synchronous>, transform_indices = @transform_9, window_bounds = array<i64: 128, 1024>}, {pipeline_mode = #tpu.pipeline_mode<synchronous>, transform_indices = @transform_10, window_bounds = array<i64: 1, 1024>}, {pipeline_mode = #tpu.pipeline_mode<synchronous>, transform_indices = @transform_11, window_bounds = array<i64: 1024, 128>}, {pipeline_mode = #tpu.pipeline_mode<synchronous>, transform_indices = @transform_12, window_bounds = array<i64: 1, 128>}, {transform_indices = @transform_13, window_bounds = array<i64: 8, 128>}]} {
    %c0 = arith.constant 0 : index
    %c0_0 = arith.constant 0 : index
    %0 = vector.load %arg1[%c0, %c0_0] : memref<128x20xf32, #tpu.memory_space<vmem>>, vector<128x20xf32>
    %c0_1 = arith.constant 0 : index
    %c0_2 = arith.constant 0 : index
    %1 = vector.load %arg2[%c0_1, %c0_2] : memref<20x32xf32, #tpu.memory_space<vmem>>, vector<20x32xf32>
    %cst = arith.constant dense<0.000000e+00> : vector<128x32xf32>
    %2 = tpu.matmul %0, %1, %cst {dimension_numbers = #tpu.dot_dimension_numbers<[1], [0], [0], [1], [0, 0, 1, 1], [], []>} : vector<128x20xf32>, vector<20x32xf32>, vector<128x32xf32> -> vector<128x32xf32>
    %c0_3 = arith.constant 0 : index
    %c0_4 = arith.constant 0 : index
    %3 = vector.load %arg3[%c0_3, %c0_4] : memref<1x32xf32, #tpu.memory_space<vmem>>, vector<1x32xf32>
    %4 = vector.broadcast %3 : vector<1x32xf32> to vector<128x32xf32>
    %5 = arith.addf %2, %4 : vector<128x32xf32>
    %cst_5 = arith.constant 0.000000e+00 : f32
    %6 = vector.broadcast %cst_5 : f32 to vector<128x32xf32>
    %7 = arith.maximumf %5, %6 : vector<128x32xf32>
    %8 = vector.extract_strided_slice %7 {offsets = [0, 0], sizes = [127, 32], strides = [1, 1]} : vector<128x32xf32> to vector<127x32xf32>
    %c1 = arith.constant 1 : index
    %c0_6 = arith.constant 0 : index
    %9 = vector.load %arg15[%c1, %c0_6] : memref<128x96xf32, #tpu.memory_space<vmem>>, vector<127x32xf32>
    tpu.vector_store %arg15[%c1, %c0_6], %8 {strides = array<i32>} : memref<128x96xf32, #tpu.memory_space<vmem>>, vector<127x32xf32>,
    %c0_7 = arith.constant 0 : index
    %c32 = arith.constant 32 : index
    %10 = vector.load %arg15[%c0_7, %c32] : memref<128x96xf32, #tpu.memory_space<vmem>>, vector<128x32xf32>
    tpu.vector_store %arg15[%c0_7, %c32], %7 {strides = array<i32>} : memref<128x96xf32, #tpu.memory_space<vmem>>, vector<128x32xf32>,
    %11 = vector.extract_strided_slice %7 {offsets = [1, 0], sizes = [127, 32], strides = [1, 1]} : vector<128x32xf32> to vector<127x32xf32>
    %c0_8 = arith.constant 0 : index
    %c64 = arith.constant 64 : index
    %12 = vector.load %arg15[%c0_8, %c64] : memref<128x96xf32, #tpu.memory_space<vmem>>, vector<127x32xf32>
    tpu.vector_store %arg15[%c0_8, %c64], %11 {strides = array<i32>} : memref<128x96xf32, #tpu.memory_space<vmem>>, vector<127x32xf32>,
    %c0_9 = arith.constant 0 : index
    %c0_10 = arith.constant 0 : index
    %13 = vector.load %arg15[%c0_9, %c0_10] : memref<128x96xf32, #tpu.memory_space<vmem>>, vector<128x96xf32>
    %14 = tpu.iota {dimensions = array<i32: 0>} : vector<128x96xi32>
    %c15_i32 = arith.constant 15 : i32
    %15 = vector.broadcast %c15_i32 : i32 to vector<128x96xi32>
    %16 = arith.andi %14, %15 : vector<128x96xi32>
    %17 = tpu.iota {dimensions = array<i32: 1>} : vector<128x96xi32>
    %c0_i32 = arith.constant 0 : i32
    %18 = vector.broadcast %c0_i32 : i32 to vector<128x96xi32>
    %19 = arith.cmpi eq, %16, %18 : vector<128x96xi32>
    %c32_i32 = arith.constant 32 : i32
    %20 = vector.broadcast %c32_i32 : i32 to vector<128x96xi32>
    %21 = arith.cmpi slt, %17, %20 : vector<128x96xi32>
    %22 = arith.andi %19, %21 : vector<128x96xi1>
    %c15_i32_11 = arith.constant 15 : i32
    %23 = vector.broadcast %c15_i32_11 : i32 to vector<128x96xi32>
    %24 = arith.cmpi eq, %16, %23 : vector<128x96xi32>
    %c64_i32 = arith.constant 64 : i32
    %25 = vector.broadcast %c64_i32 : i32 to vector<128x96xi32>
    %26 = arith.cmpi sge, %17, %25 : vector<128x96xi32>
    %27 = arith.andi %24, %26 : vector<128x96xi1>
    %28 = arith.ori %22, %27 : vector<128x96xi1>
    %cst_12 = arith.constant 0.000000e+00 : f32
    %29 = vector.broadcast %cst_12 : f32 to vector<128x96xf32>
    %30 = arith.select %28, %29, %13 : vector<128x96xi1>, vector<128x96xf32>
    %c0_13 = arith.constant 0 : index
    %c0_14 = arith.constant 0 : index
    %31 = vector.load %arg4[%c0_13, %c0_14] : memref<96x32xf32, #tpu.memory_space<vmem>>, vector<96x32xf32>
    %cst_15 = arith.constant dense<0.000000e+00> : vector<128x32xf32>
    %32 = tpu.matmul %30, %31, %cst_15 {dimension_numbers = #tpu.dot_dimension_numbers<[1], [0], [0], [1], [0, 0, 1, 1], [], []>} : vector<128x96xf32>, vector<96x32xf32>, vector<128x32xf32> -> vector<128x32xf32>
    %c0_16 = arith.constant 0 : index
    %c0_17 = arith.constant 0 : index
    %33 = vector.load %arg5[%c0_16, %c0_17] : memref<1x32xf32, #tpu.memory_space<vmem>>, vector<1x32xf32>
    %34 = vector.broadcast %33 : vector<1x32xf32> to vector<128x32xf32>
    %35 = arith.addf %32, %34 : vector<128x32xf32>
    %cst_18 = arith.constant 0.000000e+00 : f32
    %36 = vector.broadcast %cst_18 : f32 to vector<128x32xf32>
    %37 = arith.maximumf %35, %36 : vector<128x32xf32>
    %c0_19 = arith.constant 0 : index
    %c0_20 = arith.constant 0 : index
    %38 = vector.load %arg18[%c0_19, %c0_20] : memref<128x32xf32, #tpu.memory_space<vmem>>, vector<128x32xf32>
    tpu.vector_store %arg18[%c0_19, %c0_20], %37 {strides = array<i32>} : memref<128x32xf32, #tpu.memory_space<vmem>>, vector<128x32xf32>,
    %c0_21 = arith.constant 0 : index
    %c0_22 = arith.constant 0 : index
    %39 = tpu.strided_load %arg18[%c0_21, %c0_22] {strides = array<i32: 2, 1>} : memref<128x32xf32, #tpu.memory_space<vmem>>, vector<64x32xf32>
    %c1_23 = arith.constant 1 : index
    %c0_24 = arith.constant 0 : index
    %40 = tpu.strided_load %arg18[%c1_23, %c0_24] {strides = array<i32: 2, 1>} : memref<128x32xf32, #tpu.memory_space<vmem>>, vector<64x32xf32>
    %41 = arith.maximumf %39, %40 : vector<64x32xf32>
    %42 = vector.extract_strided_slice %41 {offsets = [0, 0], sizes = [63, 32], strides = [1, 1]} : vector<64x32xf32> to vector<63x32xf32>
    %c1_25 = arith.constant 1 : index
    %c0_26 = arith.constant 0 : index
    %43 = vector.load %arg16[%c1_25, %c0_26] : memref<64x96xf32, #tpu.memory_space<vmem>>, vector<63x32xf32>
    tpu.vector_store %arg16[%c1_25, %c0_26], %42 {strides = array<i32>} : memref<64x96xf32, #tpu.memory_space<vmem>>, vector<63x32xf32>,
    %c0_27 = arith.constant 0 : index
    %c32_28 = arith.constant 32 : index
    %44 = vector.load %arg16[%c0_27, %c32_28] : memref<64x96xf32, #tpu.memory_space<vmem>>, vector<64x32xf32>
    tpu.vector_store %arg16[%c0_27, %c32_28], %41 {strides = array<i32>} : memref<64x96xf32, #tpu.memory_space<vmem>>, vector<64x32xf32>,
    %45 = vector.extract_strided_slice %41 {offsets = [1, 0], sizes = [63, 32], strides = [1, 1]} : vector<64x32xf32> to vector<63x32xf32>
    %c0_29 = arith.constant 0 : index
    %c64_30 = arith.constant 64 : index
    %46 = vector.load %arg16[%c0_29, %c64_30] : memref<64x96xf32, #tpu.memory_space<vmem>>, vector<63x32xf32>
    tpu.vector_store %arg16[%c0_29, %c64_30], %45 {strides = array<i32>} : memref<64x96xf32, #tpu.memory_space<vmem>>, vector<63x32xf32>,
    %c0_31 = arith.constant 0 : index
    %c0_32 = arith.constant 0 : index
    %47 = vector.load %arg16[%c0_31, %c0_32] : memref<64x96xf32, #tpu.memory_space<vmem>>, vector<64x96xf32>
    %48 = tpu.iota {dimensions = array<i32: 0>} : vector<64x96xi32>
    %c7_i32 = arith.constant 7 : i32
    %49 = vector.broadcast %c7_i32 : i32 to vector<64x96xi32>
    %50 = arith.andi %48, %49 : vector<64x96xi32>
    %51 = tpu.iota {dimensions = array<i32: 1>} : vector<64x96xi32>
    %c0_i32_33 = arith.constant 0 : i32
    %52 = vector.broadcast %c0_i32_33 : i32 to vector<64x96xi32>
    %53 = arith.cmpi eq, %50, %52 : vector<64x96xi32>
    %c32_i32_34 = arith.constant 32 : i32
    %54 = vector.broadcast %c32_i32_34 : i32 to vector<64x96xi32>
    %55 = arith.cmpi slt, %51, %54 : vector<64x96xi32>
    %56 = arith.andi %53, %55 : vector<64x96xi1>
    %c7_i32_35 = arith.constant 7 : i32
    %57 = vector.broadcast %c7_i32_35 : i32 to vector<64x96xi32>
    %58 = arith.cmpi eq, %50, %57 : vector<64x96xi32>
    %c64_i32_36 = arith.constant 64 : i32
    %59 = vector.broadcast %c64_i32_36 : i32 to vector<64x96xi32>
    %60 = arith.cmpi sge, %51, %59 : vector<64x96xi32>
    %61 = arith.andi %58, %60 : vector<64x96xi1>
    %62 = arith.ori %56, %61 : vector<64x96xi1>
    %cst_37 = arith.constant 0.000000e+00 : f32
    %63 = vector.broadcast %cst_37 : f32 to vector<64x96xf32>
    %64 = arith.select %62, %63, %47 : vector<64x96xi1>, vector<64x96xf32>
    %c0_38 = arith.constant 0 : index
    %c0_39 = arith.constant 0 : index
    %65 = vector.load %arg6[%c0_38, %c0_39] : memref<96x64xf32, #tpu.memory_space<vmem>>, vector<96x64xf32>
    %cst_40 = arith.constant dense<0.000000e+00> : vector<64x64xf32>
    %66 = tpu.matmul %64, %65, %cst_40 {dimension_numbers = #tpu.dot_dimension_numbers<[1], [0], [0], [1], [0, 0, 1, 1], [], []>} : vector<64x96xf32>, vector<96x64xf32>, vector<64x64xf32> -> vector<64x64xf32>
    %c0_41 = arith.constant 0 : index
    %c0_42 = arith.constant 0 : index
    %67 = vector.load %arg7[%c0_41, %c0_42] : memref<1x64xf32, #tpu.memory_space<vmem>>, vector<1x64xf32>
    %68 = vector.broadcast %67 : vector<1x64xf32> to vector<64x64xf32>
    %69 = arith.addf %66, %68 : vector<64x64xf32>
    %cst_43 = arith.constant 0.000000e+00 : f32
    %70 = vector.broadcast %cst_43 : f32 to vector<64x64xf32>
    %71 = arith.maximumf %69, %70 : vector<64x64xf32>
    %c0_44 = arith.constant 0 : index
    %c0_45 = arith.constant 0 : index
    %72 = vector.load %arg19[%c0_44, %c0_45] : memref<64x64xf32, #tpu.memory_space<vmem>>, vector<64x64xf32>
    tpu.vector_store %arg19[%c0_44, %c0_45], %71 {strides = array<i32>} : memref<64x64xf32, #tpu.memory_space<vmem>>, vector<64x64xf32>,
    %c0_46 = arith.constant 0 : index
    %c0_47 = arith.constant 0 : index
    %73 = tpu.strided_load %arg19[%c0_46, %c0_47] {strides = array<i32: 2, 1>} : memref<64x64xf32, #tpu.memory_space<vmem>>, vector<32x64xf32>
    %c1_48 = arith.constant 1 : index
    %c0_49 = arith.constant 0 : index
    %74 = tpu.strided_load %arg19[%c1_48, %c0_49] {strides = array<i32: 2, 1>} : memref<64x64xf32, #tpu.memory_space<vmem>>, vector<32x64xf32>
    %75 = arith.maximumf %73, %74 : vector<32x64xf32>
    %76 = vector.extract_strided_slice %75 {offsets = [0, 0], sizes = [31, 64], strides = [1, 1]} : vector<32x64xf32> to vector<31x64xf32>
    %c1_50 = arith.constant 1 : index
    %c0_51 = arith.constant 0 : index
    %77 = vector.load %arg17[%c1_50, %c0_51] : memref<32x192xf32, #tpu.memory_space<vmem>>, vector<31x64xf32>
    tpu.vector_store %arg17[%c1_50, %c0_51], %76 {strides = array<i32>} : memref<32x192xf32, #tpu.memory_space<vmem>>, vector<31x64xf32>,
    %c0_52 = arith.constant 0 : index
    %c64_53 = arith.constant 64 : index
    %78 = vector.load %arg17[%c0_52, %c64_53] : memref<32x192xf32, #tpu.memory_space<vmem>>, vector<32x64xf32>
    tpu.vector_store %arg17[%c0_52, %c64_53], %75 {strides = array<i32>} : memref<32x192xf32, #tpu.memory_space<vmem>>, vector<32x64xf32>,
    %79 = vector.extract_strided_slice %75 {offsets = [1, 0], sizes = [31, 64], strides = [1, 1]} : vector<32x64xf32> to vector<31x64xf32>
    %c0_54 = arith.constant 0 : index
    %c128 = arith.constant 128 : index
    %80 = vector.load %arg17[%c0_54, %c128] : memref<32x192xf32, #tpu.memory_space<vmem>>, vector<31x64xf32>
    tpu.vector_store %arg17[%c0_54, %c128], %79 {strides = array<i32>} : memref<32x192xf32, #tpu.memory_space<vmem>>, vector<31x64xf32>,
    %c0_55 = arith.constant 0 : index
    %c0_56 = arith.constant 0 : index
    %81 = vector.load %arg17[%c0_55, %c0_56] : memref<32x192xf32, #tpu.memory_space<vmem>>, vector<32x192xf32>
    %82 = tpu.iota {dimensions = array<i32: 0>} : vector<32x192xi32>
    %c3_i32 = arith.constant 3 : i32
    %83 = vector.broadcast %c3_i32 : i32 to vector<32x192xi32>
    %84 = arith.andi %82, %83 : vector<32x192xi32>
    %85 = tpu.iota {dimensions = array<i32: 1>} : vector<32x192xi32>
    %c0_i32_57 = arith.constant 0 : i32
    %86 = vector.broadcast %c0_i32_57 : i32 to vector<32x192xi32>
    %87 = arith.cmpi eq, %84, %86 : vector<32x192xi32>
    %c64_i32_58 = arith.constant 64 : i32
    %88 = vector.broadcast %c64_i32_58 : i32 to vector<32x192xi32>
    %89 = arith.cmpi slt, %85, %88 : vector<32x192xi32>
    %90 = arith.andi %87, %89 : vector<32x192xi1>
    %c3_i32_59 = arith.constant 3 : i32
    %91 = vector.broadcast %c3_i32_59 : i32 to vector<32x192xi32>
    %92 = arith.cmpi eq, %84, %91 : vector<32x192xi32>
    %c128_i32 = arith.constant 128 : i32
    %93 = vector.broadcast %c128_i32 : i32 to vector<32x192xi32>
    %94 = arith.cmpi sge, %85, %93 : vector<32x192xi32>
    %95 = arith.andi %92, %94 : vector<32x192xi1>
    %96 = arith.ori %90, %95 : vector<32x192xi1>
    %cst_60 = arith.constant 0.000000e+00 : f32
    %97 = vector.broadcast %cst_60 : f32 to vector<32x192xf32>
    %98 = arith.select %96, %97, %81 : vector<32x192xi1>, vector<32x192xf32>
    %c0_61 = arith.constant 0 : index
    %c0_62 = arith.constant 0 : index
    %99 = vector.load %arg8[%c0_61, %c0_62] : memref<192x128xf32, #tpu.memory_space<vmem>>, vector<192x128xf32>
    %cst_63 = arith.constant dense<0.000000e+00> : vector<32x128xf32>
    %100 = tpu.matmul %98, %99, %cst_63 {dimension_numbers = #tpu.dot_dimension_numbers<[1], [0], [0], [1], [0, 0, 1, 1], [], []>} : vector<32x192xf32>, vector<192x128xf32>, vector<32x128xf32> -> vector<32x128xf32>
    %c0_64 = arith.constant 0 : index
    %c0_65 = arith.constant 0 : index
    %101 = vector.load %arg9[%c0_64, %c0_65] : memref<1x128xf32, #tpu.memory_space<vmem>>, vector<1x128xf32>
    %102 = vector.broadcast %101 : vector<1x128xf32> to vector<32x128xf32>
    %103 = arith.addf %100, %102 : vector<32x128xf32>
    %cst_66 = arith.constant 0.000000e+00 : f32
    %104 = vector.broadcast %cst_66 : f32 to vector<32x128xf32>
    %105 = arith.maximumf %103, %104 : vector<32x128xf32>
    %c0_67 = arith.constant 0 : index
    %c0_68 = arith.constant 0 : index
    %106 = vector.load %arg20[%c0_67, %c0_68] : memref<32x128xf32, #tpu.memory_space<vmem>>, vector<32x128xf32>
    tpu.vector_store %arg20[%c0_67, %c0_68], %105 {strides = array<i32>} : memref<32x128xf32, #tpu.memory_space<vmem>>, vector<32x128xf32>,
    %c0_69 = arith.constant 0 : index
    %c0_70 = arith.constant 0 : index
    %107 = tpu.strided_load %arg20[%c0_69, %c0_70] {strides = array<i32: 4, 1>} : memref<32x128xf32, #tpu.memory_space<vmem>>, vector<8x128xf32>
    %c1_71 = arith.constant 1 : index
    %c0_72 = arith.constant 0 : index
    %108 = tpu.strided_load %arg20[%c1_71, %c0_72] {strides = array<i32: 4, 1>} : memref<32x128xf32, #tpu.memory_space<vmem>>, vector<8x128xf32>
    %109 = arith.addf %107, %108 : vector<8x128xf32>
    %c2 = arith.constant 2 : index
    %c0_73 = arith.constant 0 : index
    %110 = tpu.strided_load %arg20[%c2, %c0_73] {strides = array<i32: 4, 1>} : memref<32x128xf32, #tpu.memory_space<vmem>>, vector<8x128xf32>
    %111 = arith.addf %109, %110 : vector<8x128xf32>
    %c3 = arith.constant 3 : index
    %c0_74 = arith.constant 0 : index
    %112 = tpu.strided_load %arg20[%c3, %c0_74] {strides = array<i32: 4, 1>} : memref<32x128xf32, #tpu.memory_space<vmem>>, vector<8x128xf32>
    %113 = arith.addf %111, %112 : vector<8x128xf32>
    %cst_75 = arith.constant 2.500000e-01 : f32
    %114 = vector.broadcast %cst_75 : f32 to vector<8x128xf32>
    %115 = arith.mulf %113, %114 : vector<8x128xf32>
    %c0_76 = arith.constant 0 : index
    %c0_77 = arith.constant 0 : index
    %116 = vector.load %arg10[%c0_76, %c0_77] : memref<128x1024xf32, #tpu.memory_space<vmem>>, vector<128x1024xf32>
    %cst_78 = arith.constant dense<0.000000e+00> : vector<8x1024xf32>
    %117 = tpu.matmul %115, %116, %cst_78 {dimension_numbers = #tpu.dot_dimension_numbers<[1], [0], [0], [1], [0, 0, 1, 1], [], []>} : vector<8x128xf32>, vector<128x1024xf32>, vector<8x1024xf32> -> vector<8x1024xf32>
    %c0_79 = arith.constant 0 : index
    %c0_80 = arith.constant 0 : index
    %118 = vector.load %arg11[%c0_79, %c0_80] : memref<1x1024xf32, #tpu.memory_space<vmem>>, vector<1x1024xf32>
    %119 = vector.broadcast %118 : vector<1x1024xf32> to vector<8x1024xf32>
    %120 = arith.addf %117, %119 : vector<8x1024xf32>
    %cst_81 = arith.constant 0.000000e+00 : f32
    %121 = vector.broadcast %cst_81 : f32 to vector<8x1024xf32>
    %122 = arith.maximumf %120, %121 : vector<8x1024xf32>
    %c0_82 = arith.constant 0 : index
    %c0_83 = arith.constant 0 : index
    %123 = vector.load %arg12[%c0_82, %c0_83] : memref<1024x128xf32, #tpu.memory_space<vmem>>, vector<1024x128xf32>
    %cst_84 = arith.constant dense<0.000000e+00> : vector<8x128xf32>
    %124 = tpu.matmul %122, %123, %cst_84 {dimension_numbers = #tpu.dot_dimension_numbers<[1], [0], [0], [1], [0, 0, 1, 1], [], []>} : vector<8x1024xf32>, vector<1024x128xf32>, vector<8x128xf32> -> vector<8x128xf32>
    %c0_85 = arith.constant 0 : index
    %c0_86 = arith.constant 0 : index
    %125 = vector.load %arg13[%c0_85, %c0_86] : memref<1x128xf32, #tpu.memory_space<vmem>>, vector<1x128xf32>
    %126 = vector.broadcast %125 : vector<1x128xf32> to vector<8x128xf32>
    %127 = arith.addf %124, %126 : vector<8x128xf32>
    %c0_87 = arith.constant 0 : index
    %c0_88 = arith.constant 0 : index
    %128 = vector.load %arg14[%c0_87, %c0_88] : memref<8x128xf32, #tpu.memory_space<vmem>>, vector<8x128xf32>
    tpu.vector_store %arg14[%c0_87, %c0_88], %127 {strides = array<i32>} : memref<8x128xf32, #tpu.memory_space<vmem>>, vector<8x128xf32>,
    return
  }
  func.func @transform_0(%arg0: i32) -> (i32, i32) {
    %c0_i32 = arith.constant 0 : i32
    %c0_i32_0 = arith.constant 0 : i32
    return %arg0, %c0_i32 : i32, i32
  }
  func.func @transform_1(%arg0: i32) -> (i32, i32) {
    %c0_i32 = arith.constant 0 : i32
    %c0_i32_0 = arith.constant 0 : i32
    %c0_i32_1 = arith.constant 0 : i32
    return %c0_i32, %c0_i32_0 : i32, i32
  }
  func.func @transform_2(%arg0: i32) -> (i32, i32) {
    %c0_i32 = arith.constant 0 : i32
    %c0_i32_0 = arith.constant 0 : i32
    %c0_i32_1 = arith.constant 0 : i32
    return %c0_i32, %c0_i32_0 : i32, i32
  }
  func.func @transform_3(%arg0: i32) -> (i32, i32) {
    %c0_i32 = arith.constant 0 : i32
    %c0_i32_0 = arith.constant 0 : i32
    %c0_i32_1 = arith.constant 0 : i32
    return %c0_i32, %c0_i32_0 : i32, i32
  }
  func.func @transform_4(%arg0: i32) -> (i32, i32) {
    %c0_i32 = arith.constant 0 : i32
    %c0_i32_0 = arith.constant 0 : i32
    %c0_i32_1 = arith.constant 0 : i32
    return %c0_i32, %c0_i32_0 : i32, i32
  }
  func.func @transform_5(%arg0: i32) -> (i32, i32) {
    %c0_i32 = arith.constant 0 : i32
    %c0_i32_0 = arith.constant 0 : i32
    %c0_i32_1 = arith.constant 0 : i32
    return %c0_i32, %c0_i32_0 : i32, i32
  }
  func.func @transform_6(%arg0: i32) -> (i32, i32) {
    %c0_i32 = arith.constant 0 : i32
    %c0_i32_0 = arith.constant 0 : i32
    %c0_i32_1 = arith.constant 0 : i32
    return %c0_i32, %c0_i32_0 : i32, i32
  }
  func.func @transform_7(%arg0: i32) -> (i32, i32) {
    %c0_i32 = arith.constant 0 : i32
    %c0_i32_0 = arith.constant 0 : i32
    %c0_i32_1 = arith.constant 0 : i32
    return %c0_i32, %c0_i32_0 : i32, i32
  }
  func.func @transform_8(%arg0: i32) -> (i32, i32) {
    %c0_i32 = arith.constant 0 : i32
    %c0_i32_0 = arith.constant 0 : i32
    %c0_i32_1 = arith.constant 0 : i32
    return %c0_i32, %c0_i32_0 : i32, i32
  }
  func.func @transform_9(%arg0: i32) -> (i32, i32) {
    %c0_i32 = arith.constant 0 : i32
    %c0_i32_0 = arith.constant 0 : i32
    %c0_i32_1 = arith.constant 0 : i32
    return %c0_i32, %c0_i32_0 : i32, i32
  }
  func.func @transform_10(%arg0: i32) -> (i32, i32) {
    %c0_i32 = arith.constant 0 : i32
    %c0_i32_0 = arith.constant 0 : i32
    %c0_i32_1 = arith.constant 0 : i32
    return %c0_i32, %c0_i32_0 : i32, i32
  }
  func.func @transform_11(%arg0: i32) -> (i32, i32) {
    %c0_i32 = arith.constant 0 : i32
    %c0_i32_0 = arith.constant 0 : i32
    %c0_i32_1 = arith.constant 0 : i32
    return %c0_i32, %c0_i32_0 : i32, i32
  }
  func.func @transform_12(%arg0: i32) -> (i32, i32) {
    %c0_i32 = arith.constant 0 : i32
    %c0_i32_0 = arith.constant 0 : i32
    %c0_i32_1 = arith.constant 0 : i32
    return %c0_i32, %c0_i32_0 : i32, i32
  }
  func.func @transform_13(%arg0: i32) -> (i32, i32) {
    %c0_i32 = arith.constant 0 : i32
    %c0_i32_0 = arith.constant 0 : i32
    return %arg0, %c0_i32 : i32, i32
  }
}

</mosaic_0001>

<bundles_post_ra>
// kernel: tpu_custom_call.1
= control target key start
LH: loop header
LB: loop body
LE: loop exit
PB: predicated region body
PF: predicated region fallthrough
CT: control target
= control target key end

     0   :  { %18 = vsyncpa [#allocation9], 0  ;;  %s4293_s0 = inlined_call_operand.vmem [shape: f32[384,20], index: 0, kind: input, shape index: {}]   ;;  %s4294_s1 = inlined_call_operand.vmem [shape: f32[20,32], index: 1, kind: input, shape index: {}]   ;;  %s4295_s2 = inlined_call_operand.vmem [shape: f32[1,32], index: 2, kind: input, shape index: {}]   ;;  %s4296_s3 = inlined_call_operand.vmem [shape: f32[96,32], index: 3, kind: input, shape index: {}]   ;;  %s4297_s4 = inlined_call_operand.vmem [shape: f32[1,32], index: 4, kind: input, shape index: {}]   ;;  %s4298_s5 = inlined_call_operand.vmem [shape: f32[96,64], index: 5, kind: input, shape index: {}]   ;;  %s4299_s6 = inlined_call_operand.vmem [shape: f32[1,64], index: 6, kind: input, shape index: {}]   ;;  %s4300_s7 = inlined_call_operand.vmem [shape: f32[192,128], index: 7, kind: input, shape index: {}]   ;;  %s4301_s8 = inlined_call_operand.vmem [shape: f32[1,128], index: 8, kind: input, shape index: {}]   ;;  %s4302_s9 = inlined_call_operand.hbm [shape: f32[128,1024], index: 9, kind: input, shape index: {}]   ;;  %s4303_s10 = inlined_call_operand.vmem [shape: f32[1,1024], index: 10, kind: input, shape index: {}]   ;;  %s4304_s11 = inlined_call_operand.hbm [shape: f32[1024,128], index: 11, kind: input, shape index: {}]   ;;  %s4305_s12 = inlined_call_operand.vmem [shape: f32[1,128], index: 12, kind: input, shape index: {}]   ;;  %s4306_s13 = inlined_call_operand.hbm [shape: f32[24,128], index: 13, kind: output, shape index: {}]  }
   0x1   :  { %19 = vsyncpa [#allocation12], 0 }
   0x2   :  { %20 = vsyncpa [#allocation10], 0 }
   0x3   :  { %22 = vsyncpa [#allocation10 + $0x1], 0  ;;  %s3532_s25 = smov 0   ;;  %s3534_s26 = smov 0  }
   0x4   :  { %s3536_s27 = smov 0   ;;  %s3538_s28 = smov 0  }
   0x5 LB: > { %4313 = sst [smem:[#allocation17_spill]] %s3438_s25  ;;  %s3553_s29 = sadd.s32 4294967295, %s3450_s28   ;;  %s3450_s28 = sphi %s3538_s28, %s4335_s28   ;;  %s3446_s27 = sphi %s3536_s27, %s4337_s27   ;;  %s3442_s26 = sphi %s3534_s26, %s4339_s26   ;;  %s3438_s25 = sphi %s3532_s25, %s4338_s25  }
   0x6   : > { %4314 = sst [smem:[#allocation18_spill]] %s3446_s27  ;;  %s2869_s30 = sadd.s32 4294967294, %s3450_s28  }
   0x7   : > { %s3557_s14 = sadd.s32 1, %s3450_s28   ;;  %s313_s15 = sadd.s32 1, %s3446_s27 }
   0x8   : > { %4315 = sst [smem:[#allocation19_spill]] %s3557_s14  ;;  %s310_s16 = ssub.s32 %s3450_s28, %s3557_s14 }
   0x9   : > { %p323_p0 = scmp.ne.s32.totalorder %s3446_s27, %s3442_s26  ;;  %p311_p1 = scmp.eq.s32.totalorder %s310_s16, 0 }
   0xa   : > { %p324_p2 = scmp.eq.s32.totalorder %s3553_s29, 2  ;;  %p329_p3 = scmp.ne.s32.totalorder %s3442_s26, %s3438_s25 }
   0xb   : > { %p330_p4 = scmp.eq.s32.totalorder %s2869_s30, 2  ;;  %p2870_p7 = scmp.ge.s32.totalorder %s3450_s28, 1 }
   0xc   : > { %s3568_s17 = scalar_select %p311_p1, %s3446_s27, %s313_s15  }
   0xd   : > { %p3570_p5 = por %p324_p2, %p323_p0  ;;  %p3574_p6 = por %p330_p4, %p329_p3 }
   0xe   : > { %4316 = sst [smem:[#allocation20_spill]] %s3568_s17  ;;  %p337_p8 = scmp.lt.s32.totalorder %s3450_s28, 4 }
   0xf   : > { %s4318_s19 = scalar_select %p3574_p6, 1, 0 }
  0x10   : > { %p4308_p9 = scmp.eq.s32.totalorder %s3553_s29, 0  ;;  %p3581_p10 = pnand %p2870_p7, %p337_p8 }
  0x11   : > { %4319 = sst [smem:[#allocation21_spill]] %s4318_s19  ;;  %s3452_s21 = smov [#allocation8]  }
  0x12   : > { %s373_s22 = sshll.u32 %s3452_s21, 4  ;;  %p3273_p11 = pneg %p3581_p10  ;;  %s374_s22 = int_to_ptr.vmem [resolvable:$true] %s373_s22 }
  0x13   : > { %s3453_s24 = smov [#allocation11]   ;;  %s3341_s15 = scalar_lea.vmem %s374_s22, 16384 }
  0x14   : > { %p3589_p12 = pnand %p4308_p9, %p3273_p11  ;;  %s389_s30 = sshll.u32 %s3453_s24, 4  ;;  %s390_s30 = int_to_ptr.vmem [resolvable:$true] %s389_s30 }
  0x15   : > { %p3342_p0 = scmp.ne.s32.totalorder %s374_s22, %s3341_s15  ;;  %p3349_p3 = scmp.lt.s32.totalorder %s374_s22, %s374_s22 }
  0x16   : > { %p3332_p13 = pneg %p3589_p12  ;;  %p3350_p4 = scmp.lt.s32.totalorder %s3341_s15, %s3341_s15 }
  0x18   : > { %p3344_p1 = pnand %p3342_p0, %p3332_p13  ;;  %p3351_p7 = por %p3350_p4, %p3349_p3 }
  0x1a   : > { %p3345_p2 = pneg %p3344_p1 }
  0x1c   : > { %p3352_p8 = pnand %p3351_p7, %p3345_p2 }
  0x1e   : > { %3355 = shalt.err (!%p3352_p8)
}
  0x1f   : > { %s3454_s16 = smov 1024   ;;  %s3455_s21 = smov 64  }
  0x20   : > { %3276 = dma.hbm_to_vmem [thread:$0]  (!%p3589_p12), %s4302_s9, 16384, %s374_s22, [#allocation9], %s3454_s16, %s3454_s16, %s3455_s21  }
  0x21   : > { %s3367_s27 = scalar_lea.vmem %s390_s30, 16384  ;;  %p3375_p9 = scmp.lt.s32.totalorder %s390_s30, %s390_s30 }
  0x22   : > { %p3368_p11 = scmp.ne.s32.totalorder %s390_s30, %s3367_s27  ;;  %p3376_p6 = scmp.lt.s32.totalorder %s3367_s27, %s3367_s27 }
  0x24   : > { %p3370_p0 = pnand %p3368_p11, %p3332_p13  ;;  %p3377_p3 = por %p3376_p6, %p3375_p9 }
  0x26   : > { %p3371_p1 = pneg %p3370_p0 }
  0x28   : > { %p3378_p2 = pnand %p3377_p3, %p3371_p1 }
  0x2a   : > { %3381 = shalt.err (!%p3378_p2)
}
  0x2b   : > { %s3456_s15 = smov 128   ;;  %s3457_s14 = smov 8  }
  0x2c   : > { %3279 = dma.hbm_to_vmem [thread:$0]  (!%p3589_p12), %s4304_s11, 16384, %s390_s30, [#allocation12], %s3456_s15, %s3456_s15, %s3457_s14  }
  0x2d   : > { %417 = sbr.rel (%p3581_p10) target bundleno = 1804 (0x70c), region = 72  ;;  %p4322_p4 = scmp.eq.s32.totalorder (!%p3581_p10), %s3553_s29, 0 }
  0x32   : > { %3425 = dma.done.wait (%p4322_p4), [#allocation9], 16384   ;;  %p4323_p13 = pmov %p4322_p4 }
  0x33   : > { %p4324_p6 = pmov %p4322_p4 }
  0x34   : > { %3427 = vsyncadd (%p4323_p13), [#allocation9], 4294950912 }
  0x35   : > { %3429 = dma.done.wait (%p4324_p6), [#allocation12], 16384   ;;  %p4325_p9 = pmov %p4322_p4 }
  0x36   : > { %s2878_s27 = sshll.u32 %s3553_s29, 4  ;;  %vm546_vm0 = vcmask 1043456   ;;  %vm497_vm1 = vcmask 162816   ;;  %v489_v0 = vld [vmem:[%s4294_s1 + $0x10] sm:$0xf]  ;;  %v488_v1 = vld [vmem:[%s4294_s1 + $0x8] sm:$0xff] }
  0x37   : > { %3431 = vsyncadd (%p4325_p9), [#allocation12], 4294950912  ;;  %p466_p7 = scmp.lt.s32.totalorder %s2878_s27, 47  ;;  %3149 = vmatprep.subr.msk.mxu1 %vm546_vm0, %v489_v0  ;;  %v487_v3 = vld [vmem:[%s4294_s1] sm:$0xff]  ;;  %v1036_v19 = vld [vmem:[%s4296_s3 + $0x58] sm:$0xff]  ;;  %vm711_vm2 = vcmask 261120  }
  0x38   : > { %3150 = vmatpush3.msk.msra.mxu1 %vm546_vm0, %v489_v0  ;;  %v1035_v20 = vld [vmem:[%s4296_s3 + $0x50] sm:$0xff]  ;;  %v1034_v21 = vld [vmem:[%s4296_s3 + $0x48] sm:$0xff]  ;;  %v1033_v22 = vld [vmem:[%s4296_s3 + $0x40] sm:$0xff]  ;;  %s3458_s23 = smov 32   ;;  %s3459_s21 = smov 64   ;;  %vm727_vm3 = vcmask 260096  }
  0x39   : > { %s4341_s27 = smov (!%p466_p7, %s2878_s27), 47  ;;  %3151 = vmatprep.subr.mxu1 %v488_v1  ;;  %v1032_v23 = vld [vmem:[%s4296_s3 + $0x38] sm:$0xff]  ;;  %v1031_v24 = vld [vmem:[%s4296_s3 + $0x30] sm:$0xff]  ;;  %v3689_v25 = vld [vmem:[%s4295_s2] ss:$0 sm:$0xff]  ;;  %vm793_vm4 = vcmask 523520  }
  0x3a   : > { %s2879_s25 = sshll.u32 %s4341_s27, 3  ;;  %3152 = vmatpush3.msra.mxu1 %v488_v1  ;;  %v1030_v26 = vld [vmem:[%s4296_s3 + $0x28] sm:$0xff]  ;;  %v1029_v28 = vld [vmem:[%s4296_s3 + $0x20] sm:$0xff]  ;;  %v1028_v31 = vld [vmem:[%s4296_s3 + $0x18] sm:$0xff]  ;;  %vm858_vm5 = vcmask 785921   ;;  %vm860_vm6 = vcmask 785920  }
  0x3b   : > { %s3625_s19 = scalar_lea.vmem %s4293_s0, %s2879_s25  ;;  %3153 = vmatprep.subr.mxu1 %v487_v3  ;;  %v1027_v35 = vld [vmem:[%s4296_s3 + $0x10] sm:$0xff]  ;;  %v1026_v39 = vld [vmem:[%s4296_s3 + $0x8] sm:$0xff]  ;;  %v1025_v43 = vld [vmem:[%s4296_s3] sm:$0xff]  ;;  %vm1044_vm12 = vcmask 785408   ;;  %s462_s16 = sand.u32 1, %s3442_s26  }
  0x3c   : > { %v471_v2 = vld [vmem:[%s3625_s19] sm:$0xff]  ;;  %v472_v4 = vld [vmem:[%s3625_s19 + $0x8] sm:$0xff]  ;;  %v473_v5 = vld [vmem:[%s3625_s19 + $0x10] sm:$0xff]  ;;  %3154 = vmatpush3.msra.mxu1 %v487_v3  ;;  %s2877_s27 = sshll.u32 %s462_s16, 3  ;;  %s2939_s25 = sshll.u32 %s3553_s29, 7 }
  0x3d   : > { %3155 = vmatprep.mubr.msk.f32.mxu1 %vm497_vm1, %v471_v2  ;;  %v474_v6 = vld [vmem:[%s3625_s19 + $0x18] sm:$0xff]  ;;  %v475_v7 = vld [vmem:[%s3625_s19 + $0x20] sm:$0xff]  ;;  %v476_v8 = vld [vmem:[%s3625_s19 + $0x28] sm:$0xff]  ;;  %3179 = vmatprep.subr.mxu1 %v1036_v19  ;;  %s464_s14 = scalar_lea.vmem [#allocation13], %s2877_s27  ;;  %s2775_s20 = scalar_lea.sflag [#allocation10], %s462_s16 }
  0x3e   : > { %3156 = vmatmul.mubr.msk.f32.vlgmr.msra.gmra.mxu1 %vm497_vm1, %v472_v4  ;;  %v477_v9 = vld [vmem:[%s3625_s19 + $0x30] sm:$0xff]  ;;  %v478_v10 = vld [vmem:[%s3625_s19 + $0x38] sm:$0xff]  ;;  %v479_v11 = vld [vmem:[%s3625_s19 + $0x40] sm:$0xff]  ;;  %s2788_s17 = sshll.u32 %s464_s14, 4  ;;  %s3461_s30 = smov [#allocation13]   ;;  %s2789_s17 = int_to_ptr.vmem [resolvable:$true] %s2788_s17 }
  0x3f   : > { %3158 = vmatprep.mubr.msk.f32.mxu1 %vm497_vm1, %v473_v5  ;;  %v480_v12 = vld [vmem:[%s3625_s19 + $0x48] sm:$0xff]  ;;  %v481_v13 = vld [vmem:[%s3625_s19 + $0x50] sm:$0xff]  ;;  %v482_v14 = vld [vmem:[%s3625_s19 + $0x58] sm:$0xff]  ;;  %3180 = vmatpush3.msra.mxu1 %v1036_v19  ;;  %s3382_s22 = scalar_lea.vmem %s2789_s17, 128  ;;  %s3386_s24 = sshll.u32 %s3461_s30, 4  ;;  %s3387_s24 = int_to_ptr.vmem [resolvable:$false] %s3386_s24 }
  0x40   : > { %v483_v15 = vld [vmem:[%s3625_s19 + $0x60] sm:$0xff]  ;;  %v484_v16 = vld [vmem:[%s3625_s19 + $0x68] sm:$0xff]  ;;  %v485_v17 = vld [vmem:[%s3625_s19 + $0x70] sm:$0xff]  ;;  %3181 = vmatprep.subr.mxu1 %v1035_v20  ;;  %p3383_p10 = scmp.ne.s32.totalorder %s2789_s17, %s3382_s22  ;;  %s3388_s29 = scalar_lea.vmem %s3387_s24, 256 }
  0x41   : > { %v486_v18 = vld [vmem:[%s3625_s19 + $0x78] sm:$0xff]  ;;  %3182 = vmatpush3.msra.mxu1 %v1035_v20  ;;  %p3389_p11 = scmp.lt.s32.totalorder %s2789_s17, %s3387_s24  ;;  %p3390_p0 = scmp.lt.s32.totalorder %s3388_s29, %s3382_s22 }
  0x42   : > { %3159 = vmatmul.mubr.msk.f32.gmra.mxu1 %vm497_vm1, %v474_v6  ;;  %3183 = vmatprep.subr.mxu1 %v1034_v21  ;;  %p3384_p12 = pnand %p3383_p10, %p3570_p5 }
  0x43   : > { %3161 = vmatprep.mubr.msk.f32.mxu1 %vm497_vm1, %v475_v7  ;;  %3184 = vmatpush3.msra.mxu1 %v1034_v21  ;;  %p3391_p1 = por %p3390_p0, %p3389_p11 }
  0x44   : > { %3185 = vmatprep.subr.mxu1 %v1033_v22  ;;  %p3385_p8 = pneg %p3384_p12 }
  0x45   : > { %3186 = vmatpush3.msra.mxu1 %v1033_v22 }
  0x46   : > { %3162 = vmatmul.mubr.msk.f32.gmra.mxu1 %vm497_vm1, %v476_v8  ;;  %3187 = vmatprep.subr.mxu1 %v1032_v23  ;;  %p3392_p3 = pnand %p3391_p1, %p3385_p8 }
  0x47   : > { %3164 = vmatprep.mubr.msk.f32.mxu1 %vm497_vm1, %v477_v9  ;;  %3188 = vmatpush3.msra.mxu1 %v1032_v23 }
  0x48   : > { %3189 = vmatprep.subr.mxu1 %v1031_v24 }
  0x49   : > { %3190 = vmatpush3.msra.mxu1 %v1031_v24 }
  0x4a   : > { %3165 = vmatmul.mubr.msk.f32.gmra.mxu1 %vm497_vm1, %v478_v10  ;;  %3191 = vmatprep.subr.mxu1 %v1030_v26 }
  0x4b   : > { %3167 = vmatprep.mubr.msk.f32.mxu1 %vm497_vm1, %v479_v11  ;;  %3192 = vmatpush3.msra.mxu1 %v1030_v26 }
  0x4c   : > { %3193 = vmatprep.subr.mxu1 %v1029_v28 }
  0x4d   : > { %3194 = vmatpush3.msra.mxu1 %v1029_v28 }
  0x4e   : > { %3168 = vmatmul.mubr.msk.f32.gmra.mxu1 %vm497_vm1, %v480_v12  ;;  %3195 = vmatprep.subr.mxu1 %v1028_v31 }
  0x4f   : > { %3170 = vmatprep.mubr.msk.f32.mxu1 %vm497_vm1, %v481_v13  ;;  %3196 = vmatpush3.msra.mxu1 %v1028_v31 }
  0x50   : > { %3197 = vmatprep.subr.mxu1 %v1027_v35 }
  0x51   : > { %3198 = vmatpush3.msra.mxu1 %v1027_v35 }
  0x52   : > { %3171 = vmatmul.mubr.msk.f32.gmra.mxu1 %vm497_vm1, %v482_v14  ;;  %3199 = vmatprep.subr.mxu1 %v1026_v39 }
  0x53   : > { %3173 = vmatprep.mubr.msk.f32.mxu1 %vm497_vm1, %v483_v15  ;;  %3200 = vmatpush3.msra.mxu1 %v1026_v39 }
  0x54   : > { %3201 = vmatprep.subr.mxu1 %v1025_v43 }
  0x55   : > { %3202 = vmatpush3.msra.mxu1 %v1025_v43 }
  0x56   : > { %3174 = vmatmul.mubr.msk.f32.gmra.mxu1 %vm497_vm1, %v484_v16  ;;  %v892_v16 = vlaneseq }
  0x57   : > { %3176 = vmatprep.mubr.msk.f32.mxu1 %vm497_vm1, %v485_v17 }
  0x5a   : > { %3177 = vmatmul.mubr.msk.f32.gmra.mxu1 %vm497_vm1, %v486_v18  ;;  %v3774_v18 = vshrl.u32 %v892_v16, 7 }
  0x5c   : > { %v3777_v21 = vadd.s32 8, %v3774_v18  ;;  %v909_v24 = vand.u32 15, %v3774_v18  ;;  %v3789_v28 = vadd.s32 16, %v3774_v18 }
  0x5e   : > { %v910_v26 = vand.u32 15, %v3777_v21  ;;  %vm927_vm7 = vcmp.eq.s32.totalorder %v909_v24, 0 }
  0x60   : > { %vm961_vm9 = vcmp.eq.s32.totalorder %v910_v26, 15 }
  0xfe   : > { %v3157_v27 = vpop.f32.mrf.mxu1 }
  0xff   : > { %v622_v29 = vadd.f32 %v3157_v27, %v3689_v25 }
 0x100   : > { %v616_v30 = vpop.f32.mrf.mxu1 }
 0x101   : > { %v696_v32 = vmax.f32 %v622_v29, 0.0  ;;  %v617_v33 = vadd.f32 %v3689_v25, %v616_v30  ;;  %v3795_v30 = vadd.s32 24, %v3774_v18 }
 0x102   : > { %v3160_v34 = vpop.f32.mrf.mxu1 }
 0x103   : > { %713 = vst.msk [vmem:[#allocation2 + $0x9] sm:$0xff] %vm711_vm2, %v696_v32  ;;  %v695_v36 = vmax.f32 %v617_v33, 0.0  ;;  %v632_v37 = vadd.f32 %v3160_v34, %v3689_v25  ;;  %747 = vrot.lane.b32.xlu0 %v696_v32, %s3458_s23  ;;  %v912_v35 = vand.u32 15, %v3795_v30 }
 0x104   : > { %v626_v38 = vpop.f32.mrf.mxu1 }
 0x105   : > { %712 = vst.msk [vmem:[#allocation2 + $0x1] sm:$0xff] %vm711_vm2, %v695_v36  ;;  %v698_v40 = vmax.f32 %v632_v37, 0.0  ;;  %v627_v41 = vadd.f32 %v3689_v25, %v626_v38  ;;  %810 = vrot.lane.b32.xlu1 %v695_v36, %s3459_s21  ;;  %vm963_vm15 = vcmp.eq.s32.totalorder %v912_v35, 15 }
 0x106   : > { %v3163_v42 = vpop.f32.mrf.mxu1 }
 0x107   : > { %715 = vst.msk [vmem:[#allocation2 + $0x19] sm:$0xff] %vm711_vm2, %v698_v40  ;;  %v697_v44 = vmax.f32 %v627_v41, 0.0  ;;  %812 = vrot.lane.b32.xlu0 %v696_v32, %s3459_s21  ;;  %v642_v45 = vadd.f32 %v3163_v42, %v3689_v25  ;;  %v911_v32 = vand.u32 15, %v3789_v28  ;;  %v3813_v42 = vadd.s32 40, %v3774_v18 }
 0x108   : > { %v636_v46 = vpop.f32.mrf.mxu1 }
 0x109   : > { %714 = vst.msk [vmem:[#allocation2 + $0x11] sm:$0xff] %vm711_vm2, %v697_v44  ;;  %v700_v47 = vmax.f32 %v642_v45, 0.0  ;;  %749 = vrot.lane.b32.xlu1 %v697_v44, %s3458_s23  ;;  %v637_v48 = vadd.f32 %v3689_v25, %v636_v46  ;;  %vm929_vm14 = vcmp.eq.s32.totalorder %v911_v32, 0 }
 0x10a   : > { %v3166_v49 = vpop.f32.mrf.mxu1 }
 0x10b   : > { %717 = vst.msk [vmem:[#allocation2 + $0x29] sm:$0xff] %vm711_vm2, %v700_v47  ;;  %v699_v50 = vmax.f32 %v637_v48, 0.0  ;;  %745 = vrot.lane.b32.xlu0 %v695_v36, %s3458_s23  ;;  %v652_v51 = vadd.f32 %v3166_v49, %v3689_v25  ;;  %v914_v48 = vand.u32 15, %v3813_v42 }
 0x10c   : > { %v646_v52 = vpop.f32.mrf.mxu1 }
 0x10d   : > { %716 = vst.msk [vmem:[#allocation2 + $0x21] sm:$0xff] %vm711_vm2, %v699_v50  ;;  %814 = vrot.lane.b32.xlu1 %v697_v44, %s3459_s21  ;;  %v702_v53 = vmax.f32 %v652_v51, 0.0  ;;  %v647_v54 = vadd.f32 %v3689_v25, %v646_v52  ;;  %v3826_v52 = vadd.s32 48, %v3774_v18 }
 0x10e   : > { %v3169_v55 = vpop.f32.mrf.mxu1 }
 0x10f   : > { %751 = vrot.lane.b32.xlu0 %v698_v40, %s3458_s23  ;;  %719 = vst.msk [vmem:[#allocation2 + $0x39] sm:$0xff] %vm711_vm2, %v702_v53  ;;  %v701_v56 = vmax.f32 %v647_v54, 0.0  ;;  %v662_v57 = vadd.f32 %v3169_v55, %v3689_v25  ;;  %v3831_v54 = vadd.s32 56, %v3774_v18 }
 0x110   : > { %v656_v58 = vpop.f32.mrf.mxu1 }
 0x111   : > { %753 = vrot.lane.b32.xlu1 %v699_v50, %s3458_s23  ;;  %718 = vst.msk [vmem:[#allocation2 + $0x31] sm:$0xff] %vm711_vm2, %v701_v56  ;;  %v704_v59 = vmax.f32 %v662_v57, 0.0  ;;  %v657_v60 = vadd.f32 %v3689_v25, %v656_v58 }
 0x112   : > { %v3172_v61 = vpop.f32.mrf.mxu1 }
 0x113   : > { %816 = vrot.lane.b32.xlu0 %v698_v40, %s3459_s21  ;;  %721 = vst.msk [vmem:[#allocation2 + $0x49] sm:$0xff] %vm711_vm2, %v704_v59  ;;  %v703_v62 = vmax.f32 %v657_v60, 0.0  ;;  %v672_v63 = vadd.f32 %v3172_v61, %v3689_v25  ;;  %v3808_v40 = vadd.s32 32, %v3774_v18  ;;  %v916_v60 = vand.u32 15, %v3831_v54 }
 0x114   : > { %v666_v0 = vpop.f32.mrf.mxu1 }
 0x115   : > { %818 = vrot.lane.b32.xlu1 %v699_v50, %s3459_s21  ;;  %720 = vst.msk [vmem:[#allocation2 + $0x41] sm:$0xff] %vm711_vm2, %v703_v62  ;;  %v706_v1 = vmax.f32 %v672_v63, 0.0  ;;  %v667_v2 = vadd.f32 %v3689_v25, %v666_v0  ;;  %v913_v44 = vand.u32 15, %v3808_v40  ;;  %v901_v0 = vadd.s32 64, %v3774_v18 }
 0x116   : > { %v3175_v3 = vpop.f32.mrf.mxu1 }
 0x117   : > { %755 = vrot.lane.b32.xlu0 %v700_v47, %s3458_s23  ;;  %723 = vst.msk [vmem:[#allocation2 + $0x59] sm:$0xff] %vm711_vm2, %v706_v1  ;;  %v705_v4 = vmax.f32 %v667_v2, 0.0  ;;  %v682_v5 = vadd.f32 %v3175_v3, %v3689_v25  ;;  %v902_v2 = vadd.s32 72, %v3774_v18 }
 0x118   : > { %v676_v6 = vpop.f32.mrf.mxu1 }
 0x119   : > { %757 = vrot.lane.b32.xlu1 %v701_v56, %s3458_s23  ;;  %722 = vst.msk [vmem:[#allocation2 + $0x51] sm:$0xff] %vm711_vm2, %v705_v4  ;;  %v708_v7 = vmax.f32 %v682_v5, 0.0  ;;  %v677_v8 = vadd.f32 %v3689_v25, %v676_v6 }
 0x11a   : > { %v3178_v9 = vpop.f32.mrf.mxu1 }
 0x11b   : > { %820 = vrot.lane.b32.xlu0 %v700_v47, %s3459_s21  ;;  %725 = vst.msk [vmem:[#allocation2 + $0x69] sm:$0xff] %vm711_vm2, %v708_v7  ;;  %v707_v10 = vmax.f32 %v677_v8, 0.0  ;;  %v692_v11 = vadd.f32 %v3178_v9, %v3689_v25  ;;  %v918_v8 = vand.u32 15, %v902_v2  ;;  %v1464_v2 = vld [vmem:[%s4298_s5 + $0x58] sm:$0xff] }
 0x11c   : > { %v686_v12 = vpop.f32.mrf.mxu1  ;;  %3227 = vmatprep.subr.mxu0 %v1464_v2 }
 0x11d   : > { %822 = vrot.lane.b32.xlu1 %v701_v56, %s3459_s21  ;;  %724 = vst.msk [vmem:[#allocation2 + $0x61] sm:$0xff] %vm711_vm2, %v707_v10  ;;  %v710_v13 = vmax.f32 %v692_v11, 0.0  ;;  %v687_v14 = vadd.f32 %v3689_v25, %v686_v12  ;;  %v3781_v25 = vand.u32 127, %v892_v16  ;;  %v915_v56 = vand.u32 15, %v3826_v52  ;;  %3228 = vmatpush3.msra.mxu0 %v1464_v2 }
 0x11e   : > { %v903_v12 = vadd.s32 80, %v3774_v18 }
 0x11f   : > { %759 = vrot.lane.b32.xlu0 %v702_v53, %s3458_s23  ;;  %728 = vst.msk [vmem:[#allocation2 + $0x79] sm:$0x7f] %vm727_vm3, %v710_v13  ;;  %v709_v15 = vmax.f32 %v687_v14, 0.0  ;;  %vm943_vm8 = vcmp.lt.s32.totalorder %v3781_v25, 32  ;;  %vm976_vm10 = vcmp.ge.s32.totalorder %v3781_v25, 64  ;;  %v904_v14 = vadd.s32 88, %v3774_v18 }
 0x120   : > { %vm944_vm11 = vmand %vm927_vm7, %vm943_vm8  ;;  %vm931_vm7 = vcmp.eq.s32.totalorder %v913_v44, 0  ;;  %v919_v16 = vand.u32 15, %v903_v12  ;;  %v1460_v12 = vld [vmem:[%s4298_s5 + $0x38] sm:$0xff] }
 0x121   : > { %761 = vrot.lane.b32.xlu1 %v703_v62, %s3458_s23  ;;  %726 = vst.msk [vmem:[#allocation2 + $0x71] sm:$0xff] %vm711_vm2, %v709_v15  ;;  %vm978_vm13 = vmand %vm961_vm9, %vm976_vm10  ;;  %vm965_vm9 = vcmp.eq.s32.totalorder %v914_v48, 15 }
 0x122   : > { %vm946_vm0 = vmand %vm929_vm14, %vm943_vm8  ;;  %vm933_vm14 = vcmp.eq.s32.totalorder %v915_v56, 0 }
 0x123   : > { %824 = vrot.lane.b32.xlu0 %v702_v53, %s3459_s21  ;;  %vm980_vm1 = vmand %vm963_vm15, %vm976_vm10  ;;  %vm967_vm15 = vcmp.eq.s32.totalorder %v916_v60, 15 }
 0x125   : > { %826 = vrot.lane.b32.xlu1 %v703_v62, %s3459_s21 }
 0x127   : > { %763 = vrot.lane.b32.xlu0 %v704_v59, %s3458_s23 }
 0x129   : > { %765 = vrot.lane.b32.xlu1 %v705_v4, %s3458_s23 }
 0x12b   : > { %828 = vrot.lane.b32.xlu0 %v704_v59, %s3459_s21 }
 0x12d   : > { %830 = vrot.lane.b32.xlu1 %v705_v4, %s3459_s21  ;;  %v917_v4 = vand.u32 15, %v901_v0 }
 0x12f   : > { %767 = vrot.lane.b32.xlu0 %v706_v1, %s3458_s23 }
 0x131   : > { %769 = vrot.lane.b32.xlu1 %v707_v10, %s3458_s23 }
 0x133   : > { %832 = vrot.lane.b32.xlu0 %v706_v1, %s3459_s21 }
 0x135   : > { %834 = vrot.lane.b32.xlu1 %v707_v10, %s3459_s21 }
 0x137   : > { %771 = vrot.lane.b32.xlu0 %v708_v7, %s3458_s23 }
 0x139   : > { %773 = vrot.lane.b32.xlu1 %v709_v15, %s3458_s23 }
 0x13b   : > { %836 = vrot.lane.b32.xlu0 %v708_v7, %s3459_s21 }
 0x13d   : > { %838 = vrot.lane.b32.xlu1 %v709_v15, %s3459_s21 }
 0x13f   : > { %775 = vrot.lane.b32.xlu0 %v710_v13, %s3458_s23 }
 0x141   : > { %840 = vrot.lane.b32.xlu1 %v710_v13, %s3459_s21 }
 0x175   : > { %v748_v17 = vpop.permute.xlu0 %747 }
 0x176   : > { %795 = vst.msk [vmem:[#allocation2 + $0x8] sm:$0xff] %vm793_vm4, %v748_v17 }
 0x177   : > { %v811_v19 = vpop.permute.xlu1 %810 }
 0x179   : > { %v813_v20 = vpop.permute.xlu0 %812 }
 0x17b   : > { %v750_v22 = vpop.permute.xlu1 %749 }
 0x17c   : > { %796 = vst.msk [vmem:[#allocation2 + $0x10] sm:$0xff] %vm793_vm4, %v750_v22  ;;  %v920_v22 = vand.u32 15, %v904_v14 }
 0x17d   : > { %v746_v23 = vpop.permute.xlu0 %745 }
 0x17e   : > { %794 = vst.msk [vmem:[#allocation2] sm:$0xff] %vm793_vm4, %v746_v23 }
 0x17f   : > { %859 = vst.msk [vmem:[#allocation2 - $0x1] sm:$0xfe] %vm858_vm5, %v811_v19  ;;  %v815_v27 = vpop.permute.xlu1 %814 }
 0x180   : > { %861 = vst.msk [vmem:[#allocation2 + $0x7] sm:$0xff] %vm860_vm6, %v813_v20  ;;  %862 = vst.msk [vmem:[#allocation2 + $0xf] sm:$0xff] %vm860_vm6, %v815_v27  ;;  %v905_v27 = vadd.s32 96, %v3774_v18 }
 0x181   : > { %v752_v29 = vpop.permute.xlu0 %751 }
 0x182   : > { %797 = vst.msk [vmem:[#allocation2 + $0x18] sm:$0xff] %vm793_vm4, %v752_v29 }
 0x183   : > { %v754_v31 = vpop.permute.xlu1 %753 }
 0x184   : > { %798 = vst.msk [vmem:[#allocation2 + $0x20] sm:$0xff] %vm793_vm4, %v754_v31  ;;  %v906_v31 = vadd.s32 104, %v3774_v18 }
 0x185   : > { %v817_v33 = vpop.permute.xlu0 %816 }
 0x186   : > { %863 = vst.msk [vmem:[#allocation2 + $0x17] sm:$0xff] %vm860_vm6, %v817_v33  ;;  %v921_v33 = vand.u32 15, %v905_v27 }
 0x187   : > { %v876_v34 = vld [vmem:[#allocation2] sm:$0xff]  ;;  %v819_v36 = vpop.permute.xlu1 %818  ;;  %v877_v38 = vld [vmem:[#allocation2 + $0x8] sm:$0xff] }
 0x188   : > { %v1009_v37 = vsel %vm944_vm11, 0.0, %v876_v34  ;;  %864 = vst.msk [vmem:[#allocation2 + $0x1f] sm:$0xff] %vm860_vm6, %v819_v36  ;;  %v1010_v39 = vsel %vm978_vm13, 0.0, %v877_v38  ;;  %vm948_vm11 = vmand %vm931_vm7, %vm943_vm8  ;;  %vm935_vm7 = vcmp.eq.s32.totalorder %v917_v4, 0  ;;  %v907_v36 = vadd.s32 112, %v3774_v18  ;;  %v1462_v4 = vld [vmem:[%s4298_s5 + $0x48] sm:$0xff] }
 0x189   : > { %3203 = vmatprep.mubr.msk.f32.mxu1 %vm1044_vm12, %v1009_v37  ;;  %v756_v41 = vpop.permute.xlu0 %755  ;;  %vm982_vm13 = vmand %vm965_vm9, %vm976_vm10  ;;  %vm969_vm9 = vcmp.eq.s32.totalorder %v918_v8, 15  ;;  %v922_v38 = vand.u32 15, %v906_v31 }
 0x18a   : > { %3204 = vmatmul.mubr.msk.f32.vlgmr.msra.gmra.mxu1 %vm1044_vm12, %v1010_v39  ;;  %799 = vst.msk [vmem:[#allocation2 + $0x28] sm:$0xff] %vm793_vm4, %v756_v41  ;;  %v908_v39 = vadd.s32 120, %v3774_v18 }
 0x18b   : > { %v758_v43 = vpop.permute.xlu1 %757 }
 0x18c   : > { %800 = vst.msk [vmem:[#allocation2 + $0x30] sm:$0xff] %vm793_vm4, %v758_v43 }
 0x18d   : > { %v821_v45 = vpop.permute.xlu0 %820  ;;  %v878_v46 = vld [vmem:[#allocation2 + $0x10] sm:$0xff] }
 0x18e   : > { %865 = vst.msk [vmem:[#allocation2 + $0x27] sm:$0xff] %vm860_vm6, %v821_v45  ;;  %v1011_v47 = vsel %vm946_vm0, 0.0, %v878_v46  ;;  %vm950_vm0 = vmand %vm933_vm14, %vm943_vm8  ;;  %vm937_vm14 = vcmp.eq.s32.totalorder %v919_v16, 0  ;;  %v923_v46 = vand.u32 15, %v907_v36 }
 0x18f   : > { %v823_v49 = vpop.permute.xlu1 %822  ;;  %3206 = vmatprep.mubr.msk.f32.mxu1 %vm1044_vm12, %v1011_v47  ;;  %v879_v50 = vld [vmem:[#allocation2 + $0x18] sm:$0xff]  ;;  %v924_v47 = vand.u32 15, %v908_v39 }
 0x190   : > { %866 = vst.msk [vmem:[#allocation2 + $0x2f] sm:$0xff] %vm860_vm6, %v823_v49  ;;  %v1012_v51 = vsel %vm980_vm1, 0.0, %v879_v50  ;;  %vm984_vm1 = vmand %vm967_vm15, %vm976_vm10  ;;  %vm971_vm15 = vcmp.eq.s32.totalorder %v920_v22, 15 }
 0x191   : > { %v760_v53 = vpop.permute.xlu0 %759  ;;  %3207 = vmatmul.mubr.msk.f32.gmra.mxu1 %vm1044_vm12, %v1012_v51 }
 0x192   : > { %801 = vst.msk [vmem:[#allocation2 + $0x38] sm:$0xff] %vm793_vm4, %v760_v53 }
 0x193   : > { %v762_v55 = vpop.permute.xlu1 %761 }
 0x194   : > { %802 = vst.msk [vmem:[#allocation2 + $0x40] sm:$0xff] %vm793_vm4, %v762_v55 }
 0x195   : > { %v825_v57 = vpop.permute.xlu0 %824  ;;  %v880_v58 = vld [vmem:[#allocation2 + $0x20] sm:$0xff] }
 0x196   : > { %867 = vst.msk [vmem:[#allocation2 + $0x37] sm:$0xff] %vm860_vm6, %v825_v57  ;;  %v1013_v59 = vsel %vm948_vm11, 0.0, %v880_v58  ;;  %vm952_vm11 = vmand %vm935_vm7, %vm943_vm8  ;;  %vm939_vm7 = vcmp.eq.s32.totalorder %v921_v33, 0 }
 0x197   : > { %v827_v61 = vpop.permute.xlu1 %826  ;;  %3209 = vmatprep.mubr.msk.f32.mxu1 %vm1044_vm12, %v1013_v59  ;;  %v881_v62 = vld [vmem:[#allocation2 + $0x28] sm:$0xff]  ;;  %v3899_v59 = vld [vmem:[%s4297_s4] ss:$0 sm:$0xff] }
 0x198   : > { %868 = vst.msk [vmem:[#allocation2 + $0x3f] sm:$0xff] %vm860_vm6, %v827_v61  ;;  %v1014_v63 = vsel %vm982_vm13, 0.0, %v881_v62  ;;  %vm986_vm13 = vmand %vm969_vm9, %vm976_vm10  ;;  %vm973_vm9 = vcmp.eq.s32.totalorder %v922_v38, 15 }
 0x199   : > { %v764_v1 = vpop.permute.xlu0 %763  ;;  %3210 = vmatmul.mubr.msk.f32.gmra.mxu1 %vm1044_vm12, %v1014_v63 }
 0x19a   : > { %803 = vst.msk [vmem:[#allocation2 + $0x48] sm:$0xff] %vm793_vm4, %v764_v1 }
 0x19b   : > { %v766_v3 = vpop.permute.xlu1 %765 }
 0x19c   : > { %804 = vst.msk [vmem:[#allocation2 + $0x50] sm:$0xff] %vm793_vm4, %v766_v3  ;;  %v1463_v3 = vld [vmem:[%s4298_s5 + $0x50] sm:$0xff] }
 0x19d   : > { %v829_v5 = vpop.permute.xlu0 %828  ;;  %v882_v6 = vld [vmem:[#allocation2 + $0x30] sm:$0xff]  ;;  %3229 = vmatprep.subr.mxu0 %v1463_v3 }
 0x19e   : > { %869 = vst.msk [vmem:[#allocation2 + $0x47] sm:$0xff] %vm860_vm6, %v829_v5  ;;  %v1015_v7 = vsel %vm950_vm0, 0.0, %v882_v6  ;;  %vm954_vm0 = vmand %vm937_vm14, %vm943_vm8  ;;  %vm941_vm14 = vcmp.eq.s32.totalorder %v923_v46, 0  ;;  %3230 = vmatpush3.msra.mxu0 %v1463_v3 }
 0x19f   : > { %v831_v9 = vpop.permute.xlu1 %830  ;;  %3212 = vmatprep.mubr.msk.f32.mxu1 %vm1044_vm12, %v1015_v7  ;;  %v883_v10 = vld [vmem:[#allocation2 + $0x38] sm:$0xff]  ;;  %3231 = vmatprep.subr.mxu0 %v1462_v4 }
 0x1a0   : > { %870 = vst.msk [vmem:[#allocation2 + $0x4f] sm:$0xff] %vm860_vm6, %v831_v9  ;;  %v1016_v11 = vsel %vm984_vm1, 0.0, %v883_v10  ;;  %vm988_vm1 = vmand %vm971_vm15, %vm976_vm10  ;;  %vm975_vm15 = vcmp.eq.s32.totalorder %v924_v47, 15  ;;  %3232 = vmatpush3.msra.mxu0 %v1462_v4  ;;  %v1461_v10 = vld [vmem:[%s4298_s5 + $0x40] sm:$0xff] }
 0x1a1   : > { %v768_v13 = vpop.permute.xlu0 %767  ;;  %3213 = vmatmul.mubr.msk.f32.gmra.mxu1 %vm1044_vm12, %v1016_v11  ;;  %3233 = vmatprep.subr.mxu0 %v1461_v10 }
 0x1a2   : > { %805 = vst.msk [vmem:[#allocation2 + $0x58] sm:$0xff] %vm793_vm4, %v768_v13  ;;  %3234 = vmatpush3.msra.mxu0 %v1461_v10  ;;  %v1459_v13 = vld [vmem:[%s4298_s5 + $0x30] sm:$0xff] }
 0x1a3   : > { %v770_v15 = vpop.permute.xlu1 %769  ;;  %3235 = vmatprep.subr.mxu0 %v1460_v12 }
 0x1a4   : > { %806 = vst.msk [vmem:[#allocation2 + $0x60] sm:$0xff] %vm793_vm4, %v770_v15  ;;  %3236 = vmatpush3.msra.mxu0 %v1460_v12 }
 0x1a5   : > { %v833_v17 = vpop.permute.xlu0 %832  ;;  %v884_v19 = vld [vmem:[#allocation2 + $0x40] sm:$0xff]  ;;  %3237 = vmatprep.subr.mxu0 %v1459_v13 }
 0x1a6   : > { %871 = vst.msk [vmem:[#allocation2 + $0x57] sm:$0xff] %vm860_vm6, %v833_v17  ;;  %v1017_v20 = vsel %vm952_vm11, 0.0, %v884_v19  ;;  %vm956_vm11 = vmand %vm939_vm7, %vm943_vm8  ;;  %v1458_v19 = vld [vmem:[%s4298_s5 + $0x28] sm:$0xff]  ;;  %3238 = vmatpush3.msra.mxu0 %v1459_v13 }
 0x1a7   : > { %v835_v23 = vpop.permute.xlu1 %834  ;;  %3215 = vmatprep.mubr.msk.f32.mxu1 %vm1044_vm12, %v1017_v20  ;;  %v885_v24 = vld [vmem:[#allocation2 + $0x48] sm:$0xff]  ;;  %3239 = vmatprep.subr.mxu0 %v1458_v19 }
 0x1a8   : > { %872 = vst.msk [vmem:[#allocation2 + $0x5f] sm:$0xff] %vm860_vm6, %v835_v23  ;;  %v1018_v26 = vsel %vm986_vm13, 0.0, %v885_v24  ;;  %vm990_vm13 = vmand %vm973_vm9, %vm976_vm10  ;;  %3240 = vmatpush3.msra.mxu0 %v1458_v19 }
 0x1a9   : > { %v772_v29 = vpop.permute.xlu0 %771  ;;  %3216 = vmatmul.mubr.msk.f32.gmra.mxu1 %vm1044_vm12, %v1018_v26  ;;  %v1457_v26 = vld [vmem:[%s4298_s5 + $0x20] sm:$0xff] }
 0x1aa   : > { %807 = vst.msk [vmem:[#allocation2 + $0x68] sm:$0xff] %vm793_vm4, %v772_v29  ;;  %3241 = vmatprep.subr.mxu0 %v1457_v26  ;;  %v1456_v29 = vld [vmem:[%s4298_s5 + $0x18] sm:$0xff] }
 0x1ab   : > { %v774_v32 = vpop.permute.xlu1 %773  ;;  %3242 = vmatpush3.msra.mxu0 %v1457_v26 }
 0x1ac   : > { %808 = vst.msk [vmem:[#allocation2 + $0x70] sm:$0xff] %vm793_vm4, %v774_v32  ;;  %3243 = vmatprep.subr.mxu0 %v1456_v29 }
 0x1ad   : > { %v837_v34 = vpop.permute.xlu0 %836  ;;  %v886_v35 = vld [vmem:[#allocation2 + $0x50] sm:$0xff]  ;;  %3244 = vmatpush3.msra.mxu0 %v1456_v29 }
 0x1ae   : > { %873 = vst.msk [vmem:[#allocation2 + $0x67] sm:$0xff] %vm860_vm6, %v837_v34  ;;  %v1019_v37 = vsel %vm954_vm0, 0.0, %v886_v35  ;;  %vm958_vm0 = vmand %vm941_vm14, %vm943_vm8  ;;  %v1455_v34 = vld [vmem:[%s4298_s5 + $0x10] sm:$0xff] }
 0x1af   : > { %v839_v41 = vpop.permute.xlu1 %838  ;;  %3218 = vmatprep.mubr.msk.f32.mxu1 %vm1044_vm12, %v1019_v37  ;;  %v887_v43 = vld [vmem:[#allocation2 + $0x58] sm:$0xff]  ;;  %v1454_v37 = vld [vmem:[%s4298_s5 + $0x8] sm:$0xff]  ;;  %3245 = vmatprep.subr.mxu0 %v1455_v34 }
 0x1b0   : > { %874 = vst.msk [vmem:[#allocation2 + $0x6f] sm:$0xff] %vm860_vm6, %v839_v41  ;;  %v1020_v44 = vsel %vm988_vm1, 0.0, %v887_v43  ;;  %vm992_vm1 = vmand %vm975_vm15, %vm976_vm10  ;;  %3246 = vmatpush3.msra.mxu0 %v1455_v34  ;;  %v1453_v43 = vld [vmem:[%s4298_s5] sm:$0xff] }
 0x1b1   : > { %v776_v45 = vpop.permute.xlu0 %775  ;;  %3219 = vmatmul.mubr.msk.f32.gmra.mxu1 %vm1044_vm12, %v1020_v44  ;;  %3247 = vmatprep.subr.mxu0 %v1454_v37 }
 0x1b2   : > { %809 = vst.msk [vmem:[#allocation2 + $0x78] sm:$0xff] %vm793_vm4, %v776_v45  ;;  %3248 = vmatpush3.msra.mxu0 %v1454_v37 }
 0x1b3   : > { %v841_v48 = vpop.permute.xlu1 %840  ;;  %3249 = vmatprep.subr.mxu0 %v1453_v43 }
 0x1b4   : > { %875 = vst.msk [vmem:[#allocation2 + $0x77] sm:$0xff] %vm860_vm6, %v841_v48  ;;  %3250 = vmatpush3.msra.mxu0 %v1453_v43 }
 0x1b5   : > { %v888_v49 = vld [vmem:[#allocation2 + $0x60] sm:$0xff] }
 0x1b6   : > { %v1021_v50 = vsel %vm956_vm11, 0.0, %v888_v49 }
 0x1b7   : > { %3221 = vmatprep.mubr.msk.f32.mxu1 %vm1044_vm12, %v1021_v50  ;;  %v889_v51 = vld [vmem:[#allocation2 + $0x68] sm:$0xff] }
 0x1b8   : > { %v1022_v53 = vsel %vm990_vm13, 0.0, %v889_v51 }
 0x1b9   : > { %3222 = vmatmul.mubr.msk.f32.gmra.mxu1 %vm1044_vm12, %v1022_v53 }
 0x1bb   : > { %v890_v55 = vld [vmem:[#allocation2 + $0x70] sm:$0xff]  ;;  %v891_v56 = vld [vmem:[#allocation2 + $0x78] sm:$0xff] }
 0x1bc   : > { %v1023_v57 = vsel %vm958_vm0, 0.0, %v890_v55  ;;  %v1024_v58 = vsel %vm992_vm1, 0.0, %v891_v56 }
 0x1bd   : > { %3224 = vmatprep.mubr.msk.f32.mxu1 %vm1044_vm12, %v1023_v57 }
 0x1be   : > { %3225 = vmatmul.mubr.msk.f32.gmra.mxu1 %vm1044_vm12, %v1024_v58 }
 0x24a   : > { %v3205_v60 = vpop.f32.mrf.mxu1 }
 0x24b   : > { %v1165_v61 = vadd.f32 %v3205_v60, %v3899_v59 }
 0x24c   : > { %v1159_v62 = vpop.f32.mrf.mxu1 }
 0x24d   : > { %v1239_v63 = vmax.f32 %v1165_v61, 0.0  ;;  %v1160_v0 = vadd.f32 %v3899_v59, %v1159_v62 }
 0x24f   : > { %1255 = vst.msk [vmem:[#allocation5 + $0x8] sm:$0xff] %vm711_vm2, %v1239_v63  ;;  %v1238_v1 = vmax.f32 %v1160_v0, 0.0 }
 0x251   : > { %1254 = vst.msk [vmem:[#allocation5] sm:$0xff] %vm711_vm2, %v1238_v1  ;;  %v3208_v5 = vpop.f32.mrf.mxu1 }
 0x252   : > { %v1175_v6 = vadd.f32 %v3208_v5, %v3899_v59 }
 0x253   : > { %v1169_v7 = vpop.f32.mrf.mxu1 }
 0x254   : > { %v1241_v8 = vmax.f32 %v1175_v6, 0.0  ;;  %v1170_v9 = vadd.f32 %v3899_v59, %v1169_v7 }
 0x256   : > { %1257 = vst.msk [vmem:[#allocation5 + $0x18] sm:$0xff] %vm711_vm2, %v1241_v8  ;;  %v1240_v11 = vmax.f32 %v1170_v9, 0.0 }
 0x258   : > { %v1270_v14 = vld [vmem:[#allocation5] ss:$2 sm:$0xff]  ;;  %v1286_v15 = vld [vmem:[#allocation5 + $0x1] ss:$2 sm:$0xff]  ;;  %1256 = vst.msk [vmem:[#allocation5 + $0x10] sm:$0xff] %vm711_vm2, %v1240_v11 }
 0x259   : > { %v1301_v16 = vmax.f32 %v1270_v14, %v1286_v15  ;;  %v3211_v17 = vpop.f32.mrf.mxu1 }
 0x25a   : > { %v1185_v20 = vadd.f32 %v3211_v17, %v3899_v59 }
 0x25b   : > { %1357 = vrot.lane.b32.xlu1 %v1301_v16, %s3459_s21  ;;  %1309 = vst.msk [vmem:[#allocation3 + $0x1] sm:$0xff] %vm711_vm2, %v1301_v16  ;;  %1325 = vrot.lane.b32.xlu0 %v1301_v16, %s3458_s23  ;;  %v1179_v22 = vpop.f32.mrf.mxu1 }
 0x25c   : > { %v1243_v23 = vmax.f32 %v1185_v20, 0.0  ;;  %v1180_v24 = vadd.f32 %v3899_v59, %v1179_v22 }
 0x25e   : > { %1259 = vst.msk [vmem:[#allocation5 + $0x28] sm:$0xff] %vm711_vm2, %v1243_v23  ;;  %v1242_v27 = vmax.f32 %v1180_v24, 0.0 }
 0x25f   : > { %v1272_v31 = vld [vmem:[#allocation5 + $0x10] ss:$2 sm:$0xff]  ;;  %v1288_v32 = vld [vmem:[#allocation5 + $0x11] ss:$2 sm:$0xff] }
 0x260   : > { %1258 = vst.msk [vmem:[#allocation5 + $0x20] sm:$0xff] %vm711_vm2, %v1242_v27  ;;  %v1302_v33 = vmax.f32 %v1272_v31, %v1288_v32  ;;  %v1397_v32 = vand.u32 7, %v3774_v18 }
 0x261   : > { %v3214_v35 = vpop.f32.mrf.mxu1 }
 0x262   : > { %v1195_v36 = vadd.f32 %v3214_v35, %v3899_v59  ;;  %1310 = vst.msk [vmem:[#allocation3 + $0x9] sm:$0xff] %vm711_vm2, %v1302_v33  ;;  %1327 = vrot.lane.b32.xlu1 %v1302_v33, %s3458_s23  ;;  %1359 = vrot.lane.b32.xlu0 %v1302_v33, %s3459_s21  ;;  %vm1421_vm7 = vcmp.eq.s32.totalorder %v1397_v32, 7  ;;  %v1398_v35 = vand.u32 7, %v3777_v21 }
 0x263   : > { %v1189_v38 = vpop.f32.mrf.mxu1  ;;  %vm1429_vm9 = vmand %vm1421_vm7, %vm976_vm10 }
 0x264   : > { %v1245_v39 = vmax.f32 %v1195_v36, 0.0  ;;  %v1190_v41 = vadd.f32 %v3899_v59, %v1189_v38  ;;  %vm1422_vm13 = vcmp.eq.s32.totalorder %v1398_v35, 7 }
 0x265   : > { %vm1430_vm15 = vmand %vm1422_vm13, %vm976_vm10 }
 0x266   : > { %1261 = vst.msk [vmem:[#allocation5 + $0x38] sm:$0xff] %vm711_vm2, %v1245_v39  ;;  %v1244_v44 = vmax.f32 %v1190_v41, 0.0  ;;  %v1399_v41 = vand.u32 7, %v3789_v28 }
 0x267   : > { %v1274_v45 = vld [vmem:[#allocation5 + $0x20] ss:$2 sm:$0xff]  ;;  %v1290_v46 = vld [vmem:[#allocation5 + $0x21] ss:$2 sm:$0xff] }
 0x268   : > { %1260 = vst.msk [vmem:[#allocation5 + $0x30] sm:$0xff] %vm711_vm2, %v1244_v44  ;;  %v1303_v47 = vmax.f32 %v1274_v45, %v1290_v46  ;;  %vm1407_vm1 = vcmp.eq.s32.totalorder %v1399_v41, 0 }
 0x269   : > { %v3217_v48 = vpop.f32.mrf.mxu1  ;;  %vm1415_vm7 = vmand %vm1407_vm1, %vm943_vm8 }
 0x26a   : > { %v1205_v49 = vadd.f32 %v3217_v48, %v3899_v59  ;;  %1311 = vst.msk [vmem:[#allocation3 + $0x11] sm:$0xff] %vm711_vm2, %v1303_v47  ;;  %1361 = vrot.lane.b32.xlu1 %v1303_v47, %s3459_s21  ;;  %1329 = vrot.lane.b32.xlu0 %v1303_v47, %s3458_s23  ;;  %v1400_v47 = vand.u32 7, %v3795_v30 }
 0x26b   : > { %v1199_v50 = vpop.f32.mrf.mxu1 }
 0x26c   : > { %v1247_v51 = vmax.f32 %v1205_v49, 0.0  ;;  %v1200_v53 = vadd.f32 %v3899_v59, %v1199_v50 }
 0x26e   : > { %1263 = vst.msk [vmem:[#allocation5 + $0x48] sm:$0xff] %vm711_vm2, %v1247_v51  ;;  %v1246_v55 = vmax.f32 %v1200_v53, 0.0  ;;  %v1401_v53 = vand.u32 7, %v3808_v40 }
 0x26f   : > { %v1276_v56 = vld [vmem:[#allocation5 + $0x30] ss:$2 sm:$0xff]  ;;  %v1292_v57 = vld [vmem:[#allocation5 + $0x31] ss:$2 sm:$0xff] }
 0x270   : > { %1262 = vst.msk [vmem:[#allocation5 + $0x40] sm:$0xff] %vm711_vm2, %v1246_v55  ;;  %v1304_v58 = vmax.f32 %v1276_v56, %v1292_v57  ;;  %vm1425_vm1 = vcmp.eq.s32.totalorder %v1401_v53, 7 }
 0x271   : > { %v3220_v60 = vpop.f32.mrf.mxu1 }
 0x272   : > { %v1215_v61 = vadd.f32 %v3220_v60, %v3899_v59  ;;  %1312 = vst.msk [vmem:[#allocation3 + $0x19] sm:$0xff] %vm711_vm2, %v1304_v58  ;;  %1331 = vrot.lane.b32.xlu0 %v1304_v58, %s3458_s23 }
 0x273   : > { %v1209_v62 = vpop.f32.mrf.mxu1 }
 0x274   : > { %v1249_v63 = vmax.f32 %v1215_v61, 0.0  ;;  %v1210_v0 = vadd.f32 %v3899_v59, %v1209_v62 }
 0x276   : > { %1265 = vst.msk [vmem:[#allocation5 + $0x58] sm:$0xff] %vm711_vm2, %v1249_v63  ;;  %v1248_v1 = vmax.f32 %v1210_v0, 0.0  ;;  %1363 = vrot.lane.b32.xlu0 %v1304_v58, %s3459_s21  ;;  %v1402_v58 = vand.u32 7, %v3813_v42  ;;  %v1403_v42 = vand.u32 7, %v3826_v52  ;;  %v1404_v63 = vand.u32 7, %v3831_v54 }
 0x277   : > { %v1278_v2 = vld [vmem:[#allocation5 + $0x40] ss:$2 sm:$0xff]  ;;  %v1294_v3 = vld [vmem:[#allocation5 + $0x41] ss:$2 sm:$0xff] }
 0x278   : > { %1264 = vst.msk [vmem:[#allocation5 + $0x50] sm:$0xff] %vm711_vm2, %v1248_v1  ;;  %v1305_v4 = vmax.f32 %v1278_v2, %v1294_v3 }
 0x279   : > { %v3223_v5 = vpop.f32.mrf.mxu1 }
 0x27a   : > { %v1225_v6 = vadd.f32 %v3223_v5, %v3899_v59  ;;  %1313 = vst.msk [vmem:[#allocation3 + $0x21] sm:$0xff] %vm711_vm2, %v1305_v4  ;;  %1333 = vrot.lane.b32.xlu1 %v1305_v4, %s3458_s23 }
 0x27b   : > { %v1219_v7 = vpop.f32.mrf.mxu1 }
 0x27c   : > { %v1251_v8 = vmax.f32 %v1225_v6, 0.0  ;;  %v1220_v9 = vadd.f32 %v3899_v59, %v1219_v7 }
 0x27e   : > { %1267 = vst.msk [vmem:[#allocation5 + $0x68] sm:$0xff] %vm711_vm2, %v1251_v8  ;;  %v1250_v10 = vmax.f32 %v1220_v9, 0.0  ;;  %v3226_v11 = vpop.f32.mrf.mxu1  ;;  %1365 = vrot.lane.b32.xlu1 %v1305_v4, %s3459_s21 }
 0x27f   : > { %v1235_v12 = vadd.f32 %v3226_v11, %v3899_v59  ;;  %v1280_v13 = vld [vmem:[#allocation5 + $0x50] ss:$2 sm:$0xff]  ;;  %v1296_v14 = vld [vmem:[#allocation5 + $0x51] ss:$2 sm:$0xff]  ;;  %v3460_v11 = vmov 0.0  }
 0x280   : > { %1266 = vst.msk [vmem:[#allocation5 + $0x60] sm:$0xff] %vm711_vm2, %v1250_v10  ;;  %v1229_v15 = vpop.f32.mrf.mxu1  ;;  %v1306_v16 = vmax.f32 %v1280_v13, %v1296_v14  ;;  %v1764_v10 = vld [vmem:[%s4300_s7 + $0x78] sm:$0xff]  ;;  %1792 = vmatprep.subr.mxu1 %v3460_v11  ;;  %v1762_v13 = vld [vmem:[%s4300_s7 + $0x68] sm:$0xff]  ;;  %v1761_v14 = vld [vmem:[%s4300_s7 + $0x60] sm:$0xff] }
 0x281   : > { %v1253_v17 = vmax.f32 %v1235_v12, 0.0  ;;  %v1230_v19 = vadd.f32 %v3899_v59, %v1229_v15  ;;  %v1763_v12 = vld [vmem:[%s4300_s7 + $0x70] sm:$0xff]  ;;  %1793 = vmatpush1.msra.mxu1 %v1764_v10  ;;  %v1760_v15 = vld [vmem:[%s4300_s7 + $0x58] sm:$0xff] }
 0x282   : > { %1314 = vst.msk [vmem:[#allocation3 + $0x29] sm:$0xff] %vm711_vm2, %v1306_v16  ;;  %1335 = vrot.lane.b32.xlu0 %v1306_v16, %s3458_s23  ;;  %1794 = vmatprep.subr.mxu1 %v3460_v11 }
 0x283   : > { %1269 = vst.msk [vmem:[#allocation5 + $0x78] sm:$0xff] %vm711_vm2, %v1253_v17  ;;  %v1252_v20 = vmax.f32 %v1230_v19, 0.0  ;;  %1795 = vmatpush1.msra.mxu1 %v1763_v12  ;;  %v1758_v17 = vld [vmem:[%s4300_s7 + $0x48] sm:$0xff]  ;;  %v1757_v19 = vld [vmem:[%s4300_s7 + $0x40] sm:$0xff] }
 0x284   : > { %1796 = vmatprep.subr.mxu1 %v3460_v11 }
 0x285   : > { %1268 = vst.msk [vmem:[#allocation5 + $0x70] sm:$0xff] %vm711_vm2, %v1252_v20  ;;  %1797 = vmatpush1.msra.mxu1 %v1762_v13  ;;  %v1756_v20 = vld [vmem:[%s4300_s7 + $0x38] sm:$0xff] }
 0x286   : > { %1367 = vrot.lane.b32.xlu0 %v1306_v16, %s3459_s21  ;;  %1798 = vmatprep.subr.mxu1 %v3460_v11  ;;  %v1759_v16 = vld [vmem:[%s4300_s7 + $0x50] sm:$0xff] }
 0x287   : > { %v1282_v22 = vld [vmem:[#allocation5 + $0x60] ss:$2 sm:$0xff]  ;;  %v1298_v23 = vld [vmem:[#allocation5 + $0x61] ss:$2 sm:$0xff]  ;;  %1799 = vmatpush1.msra.mxu1 %v1761_v14 }
 0x288   : > { %v1307_v24 = vmax.f32 %v1282_v22, %v1298_v23  ;;  %1800 = vmatprep.subr.mxu1 %v3460_v11  ;;  %v1755_v22 = vld [vmem:[%s4300_s7 + $0x30] sm:$0xff]  ;;  %v1754_v23 = vld [vmem:[%s4300_s7 + $0x28] sm:$0xff] }
 0x289   : > { %1801 = vmatpush1.msra.mxu1 %v1760_v15 }
 0x28a   : > { %1315 = vst.msk [vmem:[#allocation3 + $0x31] sm:$0xff] %vm711_vm2, %v1307_v24  ;;  %1337 = vrot.lane.b32.xlu1 %v1307_v24, %s3458_s23  ;;  %vm1405_vm2 = vcmp.eq.s32.totalorder %v1397_v32, 0  ;;  %1802 = vmatprep.subr.mxu1 %v3460_v11  ;;  %v1771_v32 = vld [vmem:[%s4300_s7 + $0xb0] sm:$0xff] }
 0x28b   : > { %1803 = vmatpush1.msra.mxu1 %v1759_v16 }
 0x28c   : > { %v1284_v26 = vld [vmem:[#allocation5 + $0x70] ss:$2 sm:$0xff]  ;;  %v1300_v59 = vld [vmem:[#allocation5 + $0x71] ss:$2 sm:$0xff]  ;;  %1804 = vmatprep.subr.mxu1 %v3460_v11 }
 0x28d   : > { %v1308_v27 = vmax.f32 %v1284_v26, %v1300_v59  ;;  %1805 = vmatpush1.msra.mxu1 %v1758_v17  ;;  %v1752_v26 = vld [vmem:[%s4300_s7 + $0x18] sm:$0xff]  ;;  %v1751_v59 = vld [vmem:[%s4300_s7 + $0x10] sm:$0xff] }
 0x28e   : > { %1369 = vrot.lane.b32.xlu1 %v1307_v24, %s3459_s21  ;;  %1806 = vmatprep.subr.mxu1 %v3460_v11  ;;  %v1753_v24 = vld [vmem:[%s4300_s7 + $0x20] sm:$0xff] }
 0x28f   : > { %1316 = vst.msk [vmem:[#allocation3 + $0x39] sm:$0x7f] %vm727_vm3, %v1308_v27  ;;  %1339 = vrot.lane.b32.xlu0 %v1308_v27, %s3458_s23  ;;  %vm1413_vm3 = vmand %vm1405_vm2, %vm943_vm8  ;;  %vm1423_vm2 = vcmp.eq.s32.totalorder %v1399_v41, 7  ;;  %1807 = vmatpush1.msra.mxu1 %v1757_v19 }
 0x290   : > { %vm1437_vm11 = vmor %vm1413_vm3, %vm1429_vm9  ;;  %1808 = vmatprep.subr.mxu1 %v3460_v11 }
 0x291   : > { %vm1431_vm3 = vmand %vm1423_vm2, %vm976_vm10  ;;  %1809 = vmatpush1.msra.mxu1 %v1756_v20 }
 0x292   : > { %1371 = vrot.lane.b32.xlu1 %v1308_v27, %s3459_s21  ;;  %vm1439_vm9 = vmor %vm1415_vm7, %vm1431_vm3  ;;  %vm1410_vm3 = vcmp.eq.s32.totalorder %v1402_v58, 0  ;;  %1810 = vmatprep.subr.mxu1 %v3460_v11  ;;  %v1750_v27 = vld [vmem:[%s4300_s7 + $0x8] sm:$0xff] }
 0x293   : > { %vm1433_vm7 = vmand %vm1425_vm1, %vm976_vm10  ;;  %vm1412_vm1 = vcmp.eq.s32.totalorder %v1404_v63, 0  ;;  %1811 = vmatpush1.msra.mxu1 %v1755_v22 }
 0x294   : > { %1812 = vmatprep.subr.mxu1 %v3460_v11 }
 0x295   : > { %1813 = vmatpush1.msra.mxu1 %v1754_v23 }
 0x296   : > { %1814 = vmatprep.subr.mxu1 %v3460_v11 }
 0x297   : > { %1815 = vmatpush1.msra.mxu1 %v1753_v24 }
 0x298   : > { %1816 = vmatprep.subr.mxu1 %v3460_v11 }
 0x299   : > { %1817 = vmatpush1.msra.mxu1 %v1752_v26 }
 0x29a   : > { %1818 = vmatprep.subr.mxu1 %v3460_v11 }
 0x29b   : > { %1819 = vmatpush1.msra.mxu1 %v1751_v59 }
 0x29c   : > { %1820 = vmatprep.subr.mxu1 %v3460_v11 }
 0x29d   : > { %1821 = vmatpush1.msra.mxu1 %v1750_v27 }
 0x29e   : > { %1822 = vmatprep.subr.mxu1 %v3460_v11 }
 0x2cd   : > { %v1358_v29 = vpop.permute.xlu1 %1357  ;;  %v1326_v31 = vpop.permute.xlu0 %1325 }
 0x2ce   : > { %1349 = vst.msk [vmem:[#allocation3] sm:$0xff] %vm793_vm4, %v1326_v31  ;;  %v1772_v31 = vld [vmem:[%s4300_s7 + $0xb8] sm:$0xff] }
 0x2cf   : > { %1381 = vst.msk [vmem:[#allocation3 - $0x1] sm:$0xfe] %vm858_vm5, %v1358_v29  ;;  %vm1406_vm5 = vcmp.eq.s32.totalorder %v1398_v35, 0  ;;  %v1749_v29 = vld [vmem:[%s4300_s7] sm:$0xff] }
 0x2d0   : > { %vm1414_vm14 = vmand %vm1406_vm5, %vm943_vm8  ;;  %vm1424_vm5 = vcmp.eq.s32.totalorder %v1400_v47, 7  ;;  %1823 = vmatpush1.msra.mxu1 %v1749_v29  ;;  %v2915_v35 = vld [vmem:[%s4299_s6] ss:$0 sm:$0xff] }
 0x2d1   : > { %vm1438_vm0 = vmor %vm1414_vm14, %vm1430_vm15  ;;  %1840 = vmatprep.subr.mxu1 %v3460_v11 }
 0x2d2   : > { %vm1432_vm14 = vmand %vm1424_vm5, %vm976_vm10  ;;  %1841 = vmatpush2.msra.mxu1 %v1772_v31 }
 0x2d3   : > { %vm4045_vm5 = vmand %vm1410_vm3, %vm943_vm8  ;;  %1842 = vmatprep.subr.mxu1 %v3460_v11 }
 0x2d4   : > { %v1328_v33 = vpop.permute.xlu1 %1327  ;;  %v1360_v34 = vpop.permute.xlu0 %1359  ;;  %1843 = vmatpush2.msra.mxu1 %v1771_v32 }
 0x2d5   : > { %1350 = vst.msk [vmem:[#allocation3 + $0x8] sm:$0xff] %vm793_vm4, %v1328_v33  ;;  %v1770_v33 = vld [vmem:[%s4300_s7 + $0xa8] sm:$0xff]  ;;  %1844 = vmatprep.subr.mxu1 %v3460_v11 }
 0x2d6   : > { %1382 = vst.msk [vmem:[#allocation3 + $0x7] sm:$0xff] %vm860_vm6, %v1360_v34  ;;  %v1769_v34 = vld [vmem:[%s4300_s7 + $0xa0] sm:$0xff]  ;;  %1845 = vmatpush2.msra.mxu1 %v1770_v33 }
 0x2d7   : > { %1846 = vmatprep.subr.mxu1 %v3460_v11 }
 0x2d8   : > { %1847 = vmatpush2.msra.mxu1 %v1769_v34 }
 0x2d9   : > { %1848 = vmatprep.subr.mxu1 %v3460_v11 }
 0x2dc   : > { %v1362_v36 = vpop.permute.xlu1 %1361  ;;  %v1330_v37 = vpop.permute.xlu0 %1329 }
 0x2dd   : > { %1351 = vst.msk [vmem:[#allocation3 + $0x10] sm:$0xff] %vm793_vm4, %v1330_v37  ;;  %v1389_v38 = vld [vmem:[#allocation3] sm:$0xff] }
 0x2de   : > { %1383 = vst.msk [vmem:[#allocation3 + $0xf] sm:$0xff] %vm860_vm6, %v1362_v36  ;;  %v1445_v39 = vsel %vm1437_vm11, 0.0, %v1389_v38  ;;  %vm1408_vm11 = vcmp.eq.s32.totalorder %v1400_v47, 0  ;;  %v1765_v47 = vld [vmem:[%s4300_s7 + $0x80] sm:$0xff] }
 0x2df   : > { %3251 = vmatprep.mubr.msk.f32.mxu0 %vm1044_vm12, %v1445_v39  ;;  %vm1416_vm13 = vmand %vm1408_vm11, %vm943_vm8 }
 0x2e0   : > { %vm1440_vm15 = vmor %vm1416_vm13, %vm1432_vm14  ;;  %vm1411_vm14 = vcmp.eq.s32.totalorder %v1403_v42, 0 }
 0x2e4   : > { %v1332_v43 = vpop.permute.xlu0 %1331 }
 0x2e5   : > { %1352 = vst.msk [vmem:[#allocation3 + $0x18] sm:$0xff] %vm793_vm4, %v1332_v43  ;;  %v1390_v44 = vld [vmem:[#allocation3 + $0x8] sm:$0xff]  ;;  %v1768_v43 = vld [vmem:[%s4300_s7 + $0x98] sm:$0xff] }
 0x2e6   : > { %v1446_v45 = vsel %vm1438_vm0, 0.0, %v1390_v44  ;;  %vm1409_vm0 = vcmp.eq.s32.totalorder %v1401_v53, 0  ;;  %v1767_v44 = vld [vmem:[%s4300_s7 + $0x90] sm:$0xff]  ;;  %1849 = vmatpush2.msra.mxu1 %v1768_v43  ;;  %v1702_v43 = vand.u32 3, %v3789_v28 }
 0x2e7   : > { %3252 = vmatmul.mubr.msk.f32.vlgmr.msra.gmra.mxu0 %vm1044_vm12, %v1446_v45  ;;  %vm4033_vm2 = vmand %vm1409_vm0, %vm943_vm8  ;;  %1850 = vmatprep.subr.mxu1 %v3460_v11 }
 0x2e8   : > { %v1364_v46 = vpop.permute.xlu0 %1363  ;;  %vm1441_vm11 = vmor %vm4033_vm2, %vm1433_vm7  ;;  %vm1428_vm7 = vcmp.eq.s32.totalorder %v1404_v63, 7  ;;  %1851 = vmatpush2.msra.mxu1 %v1767_v44 }
 0x2e9   : > { %1384 = vst.msk [vmem:[#allocation3 + $0x17] sm:$0xff] %vm860_vm6, %v1364_v46  ;;  %vm1419_vm2 = vmand %vm1411_vm14, %vm943_vm8  ;;  %v1766_v46 = vld [vmem:[%s4300_s7 + $0x88] sm:$0xff]  ;;  %1852 = vmatprep.subr.mxu1 %v3460_v11  ;;  %vm1690_vm14 = vcmask 522240  }
 0x2ea   : > { %1853 = vmatpush2.msra.mxu1 %v1766_v46 }
 0x2eb   : > { %1854 = vmatprep.subr.mxu1 %v3460_v11 }
 0x2ec   : > { %v1334_v48 = vpop.permute.xlu1 %1333  ;;  %1855 = vmatpush2.msra.mxu1 %v1765_v47  ;;  %v1703_v47 = vand.u32 3, %v3795_v30 }
 0x2ed   : > { %1353 = vst.msk [vmem:[#allocation3 + $0x20] sm:$0xff] %vm793_vm4, %v1334_v48 }
 0x2f0   : > { %v1366_v49 = vpop.permute.xlu1 %1365  ;;  %v1391_v50 = vld [vmem:[#allocation3 + $0x10] sm:$0xff] }
 0x2f1   : > { %1385 = vst.msk [vmem:[#allocation3 + $0x1f] sm:$0xff] %vm860_vm6, %v1366_v49  ;;  %v1447_v51 = vsel %vm1439_vm9, 0.0, %v1391_v50  ;;  %vm1426_vm9 = vcmp.eq.s32.totalorder %v1402_v58, 7 }
 0x2f2   : > { %3254 = vmatprep.mubr.msk.f32.mxu0 %vm1044_vm12, %v1447_v51  ;;  %vm4052_vm13 = vmand %vm1426_vm9, %vm976_vm10 }
 0x2f3   : > { %vm1442_vm0 = vmor %vm4045_vm5, %vm4052_vm13 }
 0x2f4   : > { %v1336_v55 = vpop.permute.xlu0 %1335  ;;  %vm1436_vm9 = vmand %vm1428_vm7, %vm976_vm10 }
 0x2f5   : > { %1354 = vst.msk [vmem:[#allocation3 + $0x28] sm:$0xff] %vm793_vm4, %v1336_v55 }
 0x2f8   : > { %v1368_v56 = vpop.permute.xlu0 %1367  ;;  %v1392_v57 = vld [vmem:[#allocation3 + $0x18] sm:$0xff] }
 0x2f9   : > { %1386 = vst.msk [vmem:[#allocation3 + $0x27] sm:$0xff] %vm860_vm6, %v1368_v56  ;;  %v1448_v60 = vsel %vm1440_vm15, 0.0, %v1392_v57  ;;  %vm1427_vm15 = vcmp.eq.s32.totalorder %v1403_v42, 7 }
 0x2fa   : > { %3255 = vmatmul.mubr.msk.f32.gmra.mxu0 %vm1044_vm12, %v1448_v60  ;;  %vm1435_vm3 = vmand %vm1427_vm15, %vm976_vm10  ;;  %vm1675_vm10 = vcmask 1046528   ;;  %vm1670_vm15 = vcmask 1048064  }
 0x2fc   : > { %v1338_v40 = vpop.permute.xlu1 %1337 }
 0x2fd   : > { %1355 = vst.msk [vmem:[#allocation3 + $0x30] sm:$0xff] %vm793_vm4, %v1338_v40 }
 0x300   : > { %v1370_v0 = vpop.permute.xlu1 %1369  ;;  %v1393_v1 = vld [vmem:[#allocation3 + $0x20] sm:$0xff] }
 0x301   : > { %1387 = vst.msk [vmem:[#allocation3 + $0x2f] sm:$0xff] %vm860_vm6, %v1370_v0  ;;  %v1340_v52 = vpop.permute.xlu0 %1339  ;;  %v1449_v3 = vsel %vm1441_vm11, 0.0, %v1393_v1  ;;  %vm1443_vm11 = vmor %vm1419_vm2, %vm1435_vm3 }
 0x302   : > { %1356 = vst.msk [vmem:[#allocation3 + $0x38] sm:$0xff] %vm793_vm4, %v1340_v52  ;;  %3257 = vmatprep.mubr.msk.f32.mxu0 %vm1044_vm12, %v1449_v3  ;;  %vm1420_vm4 = vmand %vm1412_vm1, %vm943_vm8  ;;  %vm1653_vm8 = vcmask 523265   ;;  %vm1709_vm1 = vcmp.lt.s32.totalorder %v3781_v25, 64  ;;  %v2013_v25 = vld [vmem:[#allocation8 + $0x3a8] sm:$0xff] }
 0x303   : > { %vm1444_vm5 = vmor %vm1420_vm4, %vm1436_vm9 }
 0x304   : > { %v1372_v54 = vpop.permute.xlu1 %1371 }
 0x305   : > { %1388 = vst.msk [vmem:[#allocation3 + $0x37] sm:$0xff] %vm860_vm6, %v1372_v54  ;;  %vm1609_vm6 = vcmask 523264  }
 0x308   : > { %v1394_v4 = vld [vmem:[#allocation3 + $0x28] sm:$0xff] }
 0x309   : > { %v1450_v5 = vsel %vm1442_vm0, 0.0, %v1394_v4 }
 0x30a   : > { %3258 = vmatmul.mubr.msk.f32.gmra.mxu0 %vm1044_vm12, %v1450_v5 }
 0x30c   : > { %v1395_v6 = vld [vmem:[#allocation3 + $0x30] sm:$0xff]  ;;  %v1396_v7 = vld [vmem:[#allocation3 + $0x38] sm:$0xff] }
 0x30d   : > { %v1451_v8 = vsel %vm1443_vm11, 0.0, %v1395_v6  ;;  %v1452_v9 = vsel %vm1444_vm5, 0.0, %v1396_v7  ;;  %vm1721_vm5 = vcmp.eq.s32.totalorder %v1702_v43, 3 }
 0x30e   : > { %3260 = vmatprep.mubr.msk.f32.mxu0 %vm1044_vm12, %v1451_v8  ;;  %v1700_v8 = vand.u32 3, %v3774_v18 }
 0x30f   : > { %3261 = vmatmul.mubr.msk.f32.gmra.mxu0 %vm1044_vm12, %v1452_v9  ;;  %vm1641_vm12 = vcmask 1040384  }
 0x310   : > { %2130 = vmatprep.mubr.f32.mxu0 %v3460_v11  ;;  %vm1719_vm13 = vcmp.eq.s32.totalorder %v1700_v8, 3  ;;  %vm1705_vm0 = vcmp.eq.s32.totalorder %v1700_v8, 0  ;;  %v1969_v8 = vld [vmem:[#allocation8 + $0x248] sm:$0xff] }
 0x311   : > { %vm1711_vm2 = vmand %vm1705_vm0, %vm1709_vm1 }
 0x312   : > { %vm2926_vm7 = vmneg %vm1711_vm2 }
 0x3a7   : > { %v3253_v36 = vpop.f32.mrf.mxu0 }
 0x3a8   : > { %v1568_v37 = vadd.f32 %v3253_v36, %v2915_v35  ;;  %v1701_v36 = vand.u32 3, %v3777_v21 }
 0x3a9   : > { %v1562_v38 = vpop.f32.mrf.mxu0 }
 0x3aa   : > { %v1602_v39 = vmax.f32 %v1568_v37, 0.0  ;;  %v1563_v41 = vadd.f32 %v2915_v35, %v1562_v38  ;;  %vm1720_vm3 = vcmp.eq.s32.totalorder %v1701_v36, 3  ;;  %vm1706_vm4 = vcmp.eq.s32.totalorder %v1701_v36, 0  ;;  %v1933_v36 = vld [vmem:[#allocation8 + $0x128] sm:$0xff] }
 0x3ab   : > { %vm1713_vm9 = vmand %vm1706_vm4, %vm1709_vm1 }
 0x3ac   : > { %1611 = vst.msk [vmem:[#allocation6 + $0x8] sm:$0xff] %vm1609_vm6, %v1602_v39  ;;  %v1601_v45 = vmax.f32 %v1563_v41, 0.0  ;;  %vm2929_vm11 = vmneg %vm1713_vm9 }
 0x3ae   : > { %1610 = vst.msk [vmem:[#allocation6] sm:$0xff] %vm1609_vm6, %v1601_v45 }
 0x3b5   : > { %v1618_v48 = vld [vmem:[#allocation6] ss:$2 sm:$0xff]  ;;  %v1626_v49 = vld [vmem:[#allocation6 + $0x1] ss:$2 sm:$0xff] }
 0x3b6   : > { %v1633_v50 = vmax.f32 %v1618_v48, %v1626_v49 }
 0x3b8   : > { %1658 = vrot.lane.b32.xlu0 %v1633_v50, %s3459_s21  ;;  %v1642_v51 = vrot.slane %v1633_v50, 7  ;;  %v1676_v63 = vrot.slane %v1633_v50, 1 }
 0x3ba   : > { %v3256_v53 = vpop.f32.mrf.mxu0  ;;  %1654 = vst.msk [vmem:[#allocation4] sm:$0xfe] %vm1653_vm8, %v1642_v51  ;;  %vm1707_vm8 = vcmp.eq.s32.totalorder %v1702_v43, 0  ;;  %v1913_v43 = vld [vmem:[#allocation8 + $0x88] sm:$0xff] }
 0x3bb   : > { %v1578_v55 = vadd.f32 %v3256_v53, %v2915_v35  ;;  %v2016_v53 = vld [vmem:[#allocation8 + $0x3c0] sm:$0xff] }
 0x3bc   : > { %v1572_v56 = vpop.f32.mrf.mxu0 }
 0x3bd   : > { %v1604_v57 = vmax.f32 %v1578_v55, 0.0  ;;  %v1573_v58 = vadd.f32 %v2915_v35, %v1572_v56  ;;  %v2021_v55 = vld [vmem:[#allocation8 + $0x3e8] sm:$0xff] }
 0x3be   : > { %2208 = vmatprep.subr.mxu1 %v2021_v55  ;;  %v2009_v56 = vld [vmem:[#allocation8 + $0x388] sm:$0xff]  ;;  %v1900_v55 = vld [vmem:[#allocation8 + $0x20] sm:$0xff] }
 0x3bf   : > { %1613 = vst.msk [vmem:[#allocation6 + $0x18] sm:$0xff] %vm1609_vm6, %v1604_v57  ;;  %v1603_v60 = vmax.f32 %v1573_v58, 0.0  ;;  %v2020_v57 = vld [vmem:[#allocation8 + $0x3e0] sm:$0xff] }
 0x3c0   : > { %v2008_v58 = vld [vmem:[#allocation8 + $0x380] sm:$0xff] }
 0x3c1   : > { %1612 = vst.msk [vmem:[#allocation6 + $0x10] sm:$0xff] %vm1609_vm6, %v1603_v60  ;;  %v2001_v60 = vld [vmem:[#allocation8 + $0x348] sm:$0xff] }
 0x3c8   : > { %v1620_v61 = vld [vmem:[#allocation6 + $0x10] ss:$2 sm:$0xff]  ;;  %v1628_v40 = vld [vmem:[#allocation6 + $0x11] ss:$2 sm:$0xff] }
 0x3c9   : > { %v1634_v42 = vmax.f32 %v1620_v61, %v1628_v40  ;;  %v2012_v61 = vld [vmem:[#allocation8 + $0x3a0] sm:$0xff] }
 0x3ca   : > { %v3259_v62 = vpop.f32.mrf.mxu0  ;;  %v2000_v40 = vld [vmem:[#allocation8 + $0x340] sm:$0xff] }
 0x3cb   : > { %v1588_v0 = vadd.f32 %v3259_v62, %v2915_v35  ;;  %1660 = vrot.lane.b32.xlu1 %v1634_v42, %s3459_s21  ;;  %v1643_v1 = vrot.slane %v1634_v42, 7  ;;  %v1677_v2 = vrot.slane %v1634_v42, 1  ;;  %v2005_v42 = vld [vmem:[#allocation8 + $0x368] sm:$0xff] }
 0x3cc   : > { %v1582_v52 = vpop.f32.mrf.mxu0  ;;  %v1993_v62 = vld [vmem:[#allocation8 + $0x308] sm:$0xff] }
 0x3cd   : > { %v1606_v3 = vmax.f32 %v1588_v0, 0.0  ;;  %v1678_v54 = vsel %vm1675_vm10, %v1676_v63, %v1677_v2  ;;  %v1583_v4 = vadd.f32 %v2915_v35, %v1582_v52  ;;  %v1644_v5 = vsel %vm1641_vm12, %v1642_v51, %v1643_v1  ;;  %v2017_v51 = vld [vmem:[#allocation8 + $0x3c8] sm:$0xff]  ;;  %v2004_v63 = vld [vmem:[#allocation8 + $0x360] sm:$0xff] }
 0x3ce   : > { %1687 = vst.msk [vmem:[#allocation4 + $0x8] sm:$0xff] %vm1609_vm6, %v1678_v54  ;;  %1655 = vst.msk [vmem:[#allocation4 + $0x10] sm:$0xff] %vm1609_vm6, %v1644_v5  ;;  %2066 = vmatprep.subr.mxu0 %v2017_v51  ;;  %v1992_v0 = vld [vmem:[#allocation8 + $0x300] sm:$0xff]  ;;  %v1989_v54 = vld [vmem:[#allocation8 + $0x2e8] sm:$0xff] }
 0x3cf   : > { %1615 = vst.msk [vmem:[#allocation6 + $0x28] sm:$0xff] %vm1609_vm6, %v1606_v3  ;;  %v1605_v6 = vmax.f32 %v1583_v4, 0.0  ;;  %v3262_v7 = vpop.f32.mrf.mxu0  ;;  %2067 = vmatpush1.msra.mxu0 %v2016_v53  ;;  %v1996_v52 = vld [vmem:[#allocation8 + $0x320] sm:$0xff]  ;;  %v1977_v4 = vld [vmem:[#allocation8 + $0x288] sm:$0xff]  ;;  %v2019_v53 = vld [vmem:[#allocation8 + $0x3d8] sm:$0xff] }
 0x3d0   : > { %v1598_v9 = vadd.f32 %v3262_v7, %v2915_v35  ;;  %2068 = vmatprep.subr.mxu0 %v2009_v56  ;;  %v1984_v3 = vld [vmem:[#allocation8 + $0x2c0] sm:$0xff]  ;;  %v1981_v7 = vld [vmem:[#allocation8 + $0x2a8] sm:$0xff]  ;;  %v2389_v56 = vld [vmem:[#allocation11 + $0xf8] sm:$0xff] }
 0x3d1   : > { %1614 = vst.msk [vmem:[#allocation6 + $0x20] sm:$0xff] %vm1609_vm6, %v1605_v6  ;;  %v1592_v10 = vpop.f32.mrf.mxu0  ;;  %2069 = vmatpush1.msra.mxu0 %v2008_v58  ;;  %v1988_v5 = vld [vmem:[#allocation8 + $0x2e0] sm:$0xff]  ;;  %v1901_v51 = vld [vmem:[#allocation8 + $0x28] sm:$0xff] }
 0x3d2   : > { %v1608_v12 = vmax.f32 %v1598_v9, 0.0  ;;  %v1593_v13 = vadd.f32 %v2915_v35, %v1592_v10  ;;  %2070 = vmatprep.subr.mxu0 %v2001_v60  ;;  %v1976_v6 = vld [vmem:[#allocation8 + $0x280] sm:$0xff] }
 0x3d3   : > { %2071 = vmatpush1.msra.mxu0 %v2000_v40  ;;  %v1980_v9 = vld [vmem:[#allocation8 + $0x2a0] sm:$0xff] }
 0x3d4   : > { %1617 = vst.msk [vmem:[#allocation6 + $0x38] sm:$0xff] %vm1609_vm6, %v1608_v12  ;;  %v1607_v14 = vmax.f32 %v1593_v13, 0.0  ;;  %2072 = vmatprep.subr.mxu0 %v1993_v62  ;;  %v1968_v10 = vld [vmem:[#allocation8 + $0x240] sm:$0xff]  ;;  %v1973_v12 = vld [vmem:[#allocation8 + $0x268] sm:$0xff] }
 0x3d5   : > { %v1693_v15 = vld [vmem:[#allocation4 + $0x8] sm:$0xff]  ;;  %2073 = vmatpush1.msra.mxu0 %v1992_v0 }
 0x3d6   : > { %1616 = vst.msk [vmem:[#allocation6 + $0x30] sm:$0xff] %vm1609_vm6, %v1607_v14  ;;  %v1742_v16 = vsel %vm1719_vm13, 0.0, %v1693_v15  ;;  %v1961_v13 = vld [vmem:[#allocation8 + $0x208] sm:$0xff]  ;;  %v1972_v14 = vld [vmem:[#allocation8 + $0x260] sm:$0xff] }
 0x3d7   : > { %2925 = vmatprep.mubr.msk.f32.mxu1 %vm1609_vm6, %v1742_v16  ;;  %v1960_v15 = vld [vmem:[#allocation8 + $0x200] sm:$0xff]  ;;  %v1965_v16 = vld [vmem:[#allocation8 + $0x228] sm:$0xff] }
 0x3d8   : > { %v1622_v17 = vld [vmem:[#allocation6 + $0x20] ss:$2 sm:$0xff]  ;;  %v1630_v19 = vld [vmem:[#allocation6 + $0x21] ss:$2 sm:$0xff] }
 0x3d9   : > { %v1635_v20 = vmax.f32 %v1622_v17, %v1630_v19  ;;  %v1953_v17 = vld [vmem:[#allocation8 + $0x1c8] sm:$0xff]  ;;  %v1964_v19 = vld [vmem:[#allocation8 + $0x220] sm:$0xff] }
 0x3db   : > { %v1645_v22 = vrot.slane %v1635_v20, 7  ;;  %v1679_v23 = vrot.slane %v1635_v20, 1  ;;  %1662 = vrot.lane.b32.xlu0 %v1635_v20, %s3459_s21  ;;  %v1952_v20 = vld [vmem:[#allocation8 + $0x1c0] sm:$0xff] }
 0x3dd   : > { %v1680_v24 = vsel %vm1675_vm10, %v1677_v2, %v1679_v23  ;;  %v1624_v26 = vld [vmem:[#allocation6 + $0x30] ss:$2 sm:$0xff]  ;;  %v1632_v59 = vld [vmem:[#allocation6 + $0x31] ss:$2 sm:$0xff]  ;;  %v1646_v27 = vsel %vm1641_vm12, %v1643_v1, %v1645_v22  ;;  %v1997_v1 = vld [vmem:[#allocation8 + $0x328] sm:$0xff] }
 0x3de   : > { %1688 = vst.msk [vmem:[#allocation4 + $0x18] sm:$0xff] %vm1609_vm6, %v1680_v24  ;;  %v1636_v29 = vmax.f32 %v1624_v26, %v1632_v59  ;;  %1656 = vst.msk [vmem:[#allocation4 + $0x20] sm:$0xff] %vm1609_vm6, %v1646_v27  ;;  %v1985_v2 = vld [vmem:[#allocation8 + $0x2c8] sm:$0xff]  ;;  %v1956_v24 = vld [vmem:[#allocation8 + $0x1e0] sm:$0xff] }
 0x3df   : > { %2074 = vmatprep.subr.mxu0 %v1985_v2  ;;  %v1944_v26 = vld [vmem:[#allocation8 + $0x180] sm:$0xff]  ;;  %v1949_v59 = vld [vmem:[#allocation8 + $0x1a8] sm:$0xff] }
 0x3e0   : > { %v1647_v31 = vrot.slane %v1636_v29, 7  ;;  %v1681_v32 = vrot.slane %v1636_v29, 1  ;;  %1664 = vrot.lane.b32.xlu1 %v1636_v29, %s3459_s21  ;;  %2075 = vmatpush1.msra.mxu0 %v1984_v3  ;;  %v1937_v27 = vld [vmem:[#allocation8 + $0x148] sm:$0xff]  ;;  %v1948_v29 = vld [vmem:[#allocation8 + $0x1a0] sm:$0xff]  ;;  %s2786_s21 = scalar_lea.hbm %s4306_s13, %s2939_s25 }
 0x3e1   : > { %2076 = vmatprep.subr.mxu0 %v1977_v4 }
 0x3e2   : > { %v1682_v33 = vsel %vm1675_vm10, %v1679_v23, %v1681_v32  ;;  %1691 = vst.msk [vmem:[#allocation4 + $0x38] sm:$0x7f] %vm1690_vm14, %v1681_v32  ;;  %v1648_v34 = vsel %vm1641_vm12, %v1645_v22, %v1647_v31  ;;  %vm1715_vm10 = vmand %vm1707_vm8, %vm1709_vm1  ;;  %vm1708_vm12 = vcmp.eq.s32.totalorder %v1703_v47, 0  ;;  %vm1722_vm14 = vcmp.eq.s32.totalorder %v1703_v47, 3  ;;  %2077 = vmatpush1.msra.mxu0 %v1976_v6  ;;  %v1957_v22 = vld [vmem:[#allocation8 + $0x1e8] sm:$0xff]  ;;  %v1936_v31 = vld [vmem:[#allocation8 + $0x140] sm:$0xff] }
 0x3e3   : > { %1689 = vst.msk [vmem:[#allocation4 + $0x28] sm:$0xff] %vm1609_vm6, %v1682_v33  ;;  %1657 = vst.msk [vmem:[#allocation4 + $0x30] sm:$0xff] %vm1609_vm6, %v1648_v34  ;;  %2078 = vmatprep.subr.mxu0 %v1969_v8  ;;  %v1945_v23 = vld [vmem:[#allocation8 + $0x188] sm:$0xff]  ;;  %v1940_v34 = vld [vmem:[#allocation8 + $0x160] sm:$0xff] }
 0x3e4   : > { %vm2932_vm13 = vmneg %vm1715_vm10  ;;  %2079 = vmatpush1.msra.mxu0 %v1968_v10  ;;  %v1941_v32 = vld [vmem:[#allocation8 + $0x168] sm:$0xff]  ;;  %v1916_v47 = vld [vmem:[#allocation8 + $0xa0] sm:$0xff] }
 0x3e5   : > { %v1695_v37 = vld [vmem:[#allocation4 + $0x18] sm:$0xff]  ;;  %vm1717_vm0 = vmand %vm1708_vm12, %vm1709_vm1  ;;  %2080 = vmatprep.subr.mxu0 %v1961_v13  ;;  %v1929_v33 = vld [vmem:[#allocation8 + $0x108] sm:$0xff] }
 0x3e6   : > { %v1744_v39 = vsel %vm1720_vm3, 0.0, %v1695_v37  ;;  %vm2935_vm2 = vmneg %vm1717_vm0  ;;  %2081 = vmatpush1.msra.mxu0 %v1960_v15  ;;  %v1921_v37 = vld [vmem:[#allocation8 + $0xc8] sm:$0xff]  ;;  %v2018_v15 = vld [vmem:[#allocation8 + $0x3d0] sm:$0xff] }
 0x3e7   : > { %2082 = vmatprep.subr.mxu0 %v1953_v17  ;;  %v2373_v17 = vld [vmem:[#allocation11 + $0x78] sm:$0xff] }
 0x3e8   : > { %2083 = vmatpush1.msra.mxu0 %v1952_v20  ;;  %v2388_v20 = vld [vmem:[#allocation11 + $0xf0] sm:$0xff] }
 0x3e9   : > { %v1699_v48 = vld [vmem:[#allocation4 + $0x38] sm:$0xff]  ;;  %2084 = vmatprep.subr.mxu0 %v1945_v23  ;;  %v2372_v23 = vld [vmem:[#allocation11 + $0x70] sm:$0xff] }
 0x3ea   : > { %v1697_v21 = vld [vmem:[#allocation4 + $0x28] sm:$0xff]  ;;  %v1748_v50 = vsel %vm1722_vm14, 0.0, %v1699_v48  ;;  %2085 = vmatpush1.msra.mxu0 %v1944_v26 }
 0x3eb   : > { %v1746_v45 = vsel %vm1721_vm5, 0.0, %v1697_v21  ;;  %2086 = vmatprep.subr.mxu0 %v1937_v27  ;;  %v1924_v21 = vld [vmem:[#allocation8 + $0xe0] sm:$0xff]  ;;  %v1909_v48 = vld [vmem:[#allocation8 + $0x68] sm:$0xff] }
 0x3ec   : > { %2087 = vmatpush1.msra.mxu0 %v1936_v31  ;;  %v2387_v26 = vld [vmem:[#allocation11 + $0xe8] sm:$0xff]  ;;  %v2386_v31 = vld [vmem:[#allocation11 + $0xe0] sm:$0xff] }
 0x3ed   : > { %2088 = vmatprep.subr.mxu0 %v1929_v33  ;;  %v2371_v27 = vld [vmem:[#allocation11 + $0x68] sm:$0xff]  ;;  %v2370_v33 = vld [vmem:[#allocation11 + $0x60] sm:$0xff] }
 0x42a   : > { %v1659_v35 = vpop.permute.xlu0 %1658 }
 0x42b   : > { %1671 = vst.msk [vmem:[#allocation4] sm:$0xff] %vm1670_vm15, %v1659_v35  ;;  %v1928_v35 = vld [vmem:[#allocation8 + $0x100] sm:$0xff] }
 0x42c   : > { %2089 = vmatpush1.msra.mxu0 %v1928_v35  ;;  %v2385_v35 = vld [vmem:[#allocation11 + $0xd8] sm:$0xff] }
 0x42d   : > { %2090 = vmatprep.subr.mxu0 %v1921_v37  ;;  %v2369_v37 = vld [vmem:[#allocation11 + $0x58] sm:$0xff] }
 0x432   : > { %v1692_v38 = vld [vmem:[#allocation4] sm:$0xff] }
 0x433   : > { %2927 = vmatmul.mubr.msk.f32.vlgmr.msra.gmra.mxu1 %vm2926_vm7, %v1692_v38  ;;  %v1932_v38 = vld [vmem:[#allocation8 + $0x120] sm:$0xff] }
 0x434   : > { %2928 = vmatprep.mubr.msk.f32.mxu1 %vm1609_vm6, %v1744_v39  ;;  %2209 = vmatpush1.msra.mxu1 %v2020_v57  ;;  %v1920_v39 = vld [vmem:[#allocation8 + $0xc0] sm:$0xff] }
 0x435   : > { %2210 = vmatprep.subr.mxu1 %v2013_v25  ;;  %2091 = vmatpush1.msra.mxu0 %v1920_v39  ;;  %v2924_v57 = vld [vmem:[%s4301_s8] ss:$0 sm:$0xff]  ;;  %v2384_v39 = vld [vmem:[#allocation11 + $0xd0] sm:$0xff] }
 0x436   : > { %2211 = vmatpush1.msra.mxu1 %v2012_v61  ;;  %2092 = vmatprep.subr.mxu0 %v1913_v43  ;;  %v2368_v43 = vld [vmem:[#allocation11 + $0x50] sm:$0xff] }
 0x437   : > { %2212 = vmatprep.subr.mxu1 %v2005_v42 }
 0x438   : > { %2213 = vmatpush1.msra.mxu1 %v2004_v63 }
 0x439   : > { %2214 = vmatprep.subr.mxu1 %v1997_v1 }
 0x43a   : > { %2215 = vmatpush1.msra.mxu1 %v1996_v52 }
 0x43b   : > { %2216 = vmatprep.subr.mxu1 %v1989_v54 }
 0x43c   : > { %2217 = vmatpush1.msra.mxu1 %v1988_v5 }
 0x43d   : > { %v1661_v41 = vpop.permute.xlu1 %1660  ;;  %2218 = vmatprep.subr.mxu1 %v1981_v7 }
 0x43e   : > { %1672 = vst.msk [vmem:[#allocation4 + $0x10] sm:$0xff] %vm1670_vm15, %v1661_v41  ;;  %2219 = vmatpush1.msra.mxu1 %v1980_v9  ;;  %v1925_v41 = vld [vmem:[#allocation8 + $0xe8] sm:$0xff] }
 0x43f   : > { %2220 = vmatprep.subr.mxu1 %v1973_v12 }
 0x440   : > { %2221 = vmatpush1.msra.mxu1 %v1972_v14 }
 0x441   : > { %2222 = vmatprep.subr.mxu1 %v1965_v16  ;;  %v2011_v16 = vld [vmem:[#allocation8 + $0x398] sm:$0xff] }
 0x442   : > { %2223 = vmatpush1.msra.mxu1 %v1964_v19  ;;  %v2010_v19 = vld [vmem:[#allocation8 + $0x390] sm:$0xff] }
 0x443   : > { %2224 = vmatprep.subr.mxu1 %v1957_v22  ;;  %v2003_v22 = vld [vmem:[#allocation8 + $0x358] sm:$0xff] }
 0x444   : > { %2225 = vmatpush1.msra.mxu1 %v1956_v24  ;;  %v2002_v24 = vld [vmem:[#allocation8 + $0x350] sm:$0xff] }
 0x445   : > { %v1694_v44 = vld [vmem:[#allocation4 + $0x10] sm:$0xff]  ;;  %2226 = vmatprep.subr.mxu1 %v1949_v59  ;;  %v1995_v59 = vld [vmem:[#allocation8 + $0x318] sm:$0xff] }
 0x446   : > { %2930 = vmatmul.mubr.msk.f32.gmra.mxu1 %vm2929_vm11, %v1694_v44  ;;  %v1912_v44 = vld [vmem:[#allocation8 + $0x80] sm:$0xff] }
 0x447   : > { %2931 = vmatprep.mubr.msk.f32.mxu1 %vm1609_vm6, %v1746_v45  ;;  %2227 = vmatpush1.msra.mxu1 %v1948_v29  ;;  %v1917_v45 = vld [vmem:[#allocation8 + $0xa8] sm:$0xff]  ;;  %v1994_v29 = vld [vmem:[#allocation8 + $0x310] sm:$0xff] }
 0x448   : > { %2228 = vmatprep.subr.mxu1 %v1941_v32  ;;  %2093 = vmatpush1.msra.mxu0 %v1912_v44  ;;  %v1987_v32 = vld [vmem:[#allocation8 + $0x2d8] sm:$0xff]  ;;  %v2383_v44 = vld [vmem:[#allocation11 + $0xc8] sm:$0xff] }
 0x449   : > { %2229 = vmatpush1.msra.mxu1 %v1940_v34  ;;  %v1986_v34 = vld [vmem:[#allocation8 + $0x2d0] sm:$0xff] }
 0x44a   : > { %2230 = vmatprep.subr.mxu1 %v1933_v36  ;;  %v1979_v36 = vld [vmem:[#allocation8 + $0x298] sm:$0xff] }
 0x44b   : > { %2231 = vmatpush1.msra.mxu1 %v1932_v38  ;;  %v1978_v38 = vld [vmem:[#allocation8 + $0x290] sm:$0xff] }
 0x44c   : > { %2232 = vmatprep.subr.mxu1 %v1925_v41  ;;  %v1971_v41 = vld [vmem:[#allocation8 + $0x258] sm:$0xff] }
 0x44d   : > { %v1663_v46 = vpop.permute.xlu0 %1662  ;;  %2233 = vmatpush1.msra.mxu1 %v1924_v21  ;;  %v1970_v21 = vld [vmem:[#allocation8 + $0x250] sm:$0xff] }
 0x44e   : > { %1673 = vst.msk [vmem:[#allocation4 + $0x20] sm:$0xff] %vm1670_vm15, %v1663_v46  ;;  %v1905_v46 = vld [vmem:[#allocation8 + $0x48] sm:$0xff]  ;;  %2234 = vmatprep.subr.mxu1 %v1917_v45  ;;  %v1963_v45 = vld [vmem:[#allocation8 + $0x218] sm:$0xff] }
 0x44f   : > { %2094 = vmatprep.subr.mxu0 %v1905_v46  ;;  %2235 = vmatpush1.msra.mxu1 %v1916_v47  ;;  %v2367_v46 = vld [vmem:[#allocation11 + $0x48] sm:$0xff]  ;;  %v1962_v47 = vld [vmem:[#allocation8 + $0x210] sm:$0xff] }
 0x450   : > { %2236 = vmatprep.subr.mxu1 %v1909_v48  ;;  %v1955_v48 = vld [vmem:[#allocation8 + $0x1d8] sm:$0xff] }
 0x452   : > { %v1665_v28 = vpop.permute.xlu1 %1664 }
 0x453   : > { %1674 = vst.msk [vmem:[#allocation4 + $0x30] sm:$0xff] %vm1670_vm15, %v1665_v28  ;;  %v1904_v28 = vld [vmem:[#allocation8 + $0x40] sm:$0xff] }
 0x454   : > { %2095 = vmatpush1.msra.mxu0 %v1904_v28  ;;  %v2382_v28 = vld [vmem:[#allocation11 + $0xc0] sm:$0xff] }
 0x455   : > { %v1696_v49 = vld [vmem:[#allocation4 + $0x20] sm:$0xff] }
 0x456   : > { %2933 = vmatmul.mubr.msk.f32.gmra.mxu1 %vm2932_vm13, %v1696_v49  ;;  %v1897_v49 = vld [vmem:[#allocation8 + $0x8] sm:$0xff] }
 0x457   : > { %2934 = vmatprep.mubr.msk.f32.mxu1 %vm1609_vm6, %v1748_v50  ;;  %v1908_v50 = vld [vmem:[#allocation8 + $0x60] sm:$0xff]  ;;  %2096 = vmatprep.subr.mxu0 %v1897_v49 }
 0x458   : > { %2237 = vmatpush1.msra.mxu1 %v1908_v50  ;;  %v2366_v49 = vld [vmem:[#allocation11 + $0x40] sm:$0xff]  ;;  %v1954_v50 = vld [vmem:[#allocation8 + $0x1d0] sm:$0xff] }
 0x459   : > { %2238 = vmatprep.subr.mxu1 %v1901_v51  ;;  %v1947_v51 = vld [vmem:[#allocation8 + $0x198] sm:$0xff] }
 0x45a   : > { %v1698_v30 = vld [vmem:[#allocation4 + $0x30] sm:$0xff]  ;;  %2239 = vmatpush1.msra.mxu1 %v1900_v55 }
 0x45b   : > { %2936 = vmatmul.mubr.msk.f32.gmra.mxu1 %vm2935_vm2, %v1698_v30  ;;  %v1896_v30 = vld [vmem:[#allocation8] sm:$0xff]  ;;  %3009 = vmatprep.subr.mxu1 %v2389_v56  ;;  %v1946_v55 = vld [vmem:[#allocation8 + $0x190] sm:$0xff] }
 0x45c   : > { %2272 = vmatprep.mubr.f32.mxu1 %v3460_v11  ;;  %2097 = vmatpush1.msra.mxu0 %v1896_v30  ;;  %v2381_v30 = vld [vmem:[#allocation11 + $0xb8] sm:$0xff]  ;;  %v2380_v56 = vld [vmem:[#allocation11 + $0xb0] sm:$0xff] }
 0x45d   : > { %2137 = vmatprep.subr.mxu0 %v2019_v53  ;;  %v2365_v53 = vld [vmem:[#allocation11 + $0x38] sm:$0xff] }
 0x4f3   : > { %v1858_v58 = vpop.f32.mrf.mxu1 }
 0x4f4   : > { %v1859_v25 = vadd.f32 %v2924_v57, %v1858_v58  ;;  %v2364_v58 = vld [vmem:[#allocation11 + $0x30] sm:$0xff] }
 0x4f5   : > { %v1860_v60 = vpop.f32.mrf.mxu1 }
 0x4f6   : > { %v1877_v61 = vmax.f32 %v1859_v25, 0.0  ;;  %v1938_v25 = vld [vmem:[#allocation8 + $0x150] sm:$0xff]  ;;  %v2379_v60 = vld [vmem:[#allocation11 + $0xa8] sm:$0xff] }
 0x4f8   : > { %1881 = vst [vmem:[#allocation7] sm:$0xff] %v1877_v61  ;;  %v1931_v61 = vld [vmem:[#allocation8 + $0x118] sm:$0xff] }
 0x506   : > { %v1863_v40 = vpop.f32.mrf.mxu1 }
 0x507   : > { %v1864_v42 = vadd.f32 %v2924_v57, %v1863_v40  ;;  %v2363_v40 = vld [vmem:[#allocation11 + $0x28] sm:$0xff] }
 0x508   : > { %v1865_v62 = vpop.f32.mrf.mxu1 }
 0x509   : > { %v1878_v63 = vmax.f32 %v1864_v42, 0.0  ;;  %v1930_v42 = vld [vmem:[#allocation8 + $0x110] sm:$0xff]  ;;  %v2378_v62 = vld [vmem:[#allocation11 + $0xa0] sm:$0xff] }
 0x50b   : > { %1882 = vst [vmem:[#allocation7 + $0x8] sm:$0xff] %v1878_v63  ;;  %v1923_v63 = vld [vmem:[#allocation8 + $0xd8] sm:$0xff] }
 0x516   : > { %v1868_v0 = vpop.f32.mrf.mxu1 }
 0x517   : > { %v1869_v1 = vadd.f32 %v2924_v57, %v1868_v0  ;;  %v2362_v0 = vld [vmem:[#allocation11 + $0x20] sm:$0xff] }
 0x518   : > { %v1870_v2 = vpop.f32.mrf.mxu1 }
 0x519   : > { %v1879_v52 = vmax.f32 %v1869_v1, 0.0  ;;  %v1922_v1 = vld [vmem:[#allocation8 + $0xd0] sm:$0xff]  ;;  %v2377_v2 = vld [vmem:[#allocation11 + $0x98] sm:$0xff] }
 0x51b   : > { %1883 = vst [vmem:[#allocation7 + $0x10] sm:$0xff] %v1879_v52  ;;  %v1873_v3 = vpop.f32.mrf.mxu1  ;;  %v1915_v52 = vld [vmem:[#allocation8 + $0x98] sm:$0xff] }
 0x51c   : > { %v1874_v54 = vadd.f32 %v2924_v57, %v1873_v3  ;;  %v1939_v57 = vld [vmem:[#allocation8 + $0x158] sm:$0xff]  ;;  %v1914_v3 = vld [vmem:[#allocation8 + $0x90] sm:$0xff] }
 0x51d   : > { %v1875_v4 = vpop.f32.mrf.mxu1 }
 0x51e   : > { %v1880_v5 = vmax.f32 %v1874_v54, 0.0  ;;  %v1907_v54 = vld [vmem:[#allocation8 + $0x58] sm:$0xff]  ;;  %v1906_v4 = vld [vmem:[#allocation8 + $0x50] sm:$0xff] }
 0x520   : > { %1884 = vst [vmem:[#allocation7 + $0x18] sm:$0xff] %v1880_v5  ;;  %v1899_v5 = vld [vmem:[#allocation8 + $0x18] sm:$0xff] }
 0x527   : > { %v1885_v6 = vld [vmem:[#allocation7] ss:$4 sm:$0xff]  ;;  %v1887_v7 = vld [vmem:[#allocation7 + $0x1] ss:$4 sm:$0xff]  ;;  %v1890_v9 = vld [vmem:[#allocation7 + $0x2] ss:$4 sm:$0xff] }
 0x528   : > { %v1888_v8 = vadd.f32 %v1887_v7, %v1885_v6  ;;  %v1893_v12 = vld [vmem:[#allocation7 + $0x3] ss:$4 sm:$0xff] }
 0x529   : > { %v1898_v6 = vld [vmem:[#allocation8 + $0x10] sm:$0xff]  ;;  %v2023_v7 = vld [vmem:[#allocation8 + $0x3f8] sm:$0xff] }
 0x52a   : > { %v1891_v10 = vadd.f32 %v1890_v9, %v1888_v8  ;;  %v2022_v8 = vld [vmem:[#allocation8 + $0x3f0] sm:$0xff]  ;;  %v2015_v9 = vld [vmem:[#allocation8 + $0x3b8] sm:$0xff] }
 0x52c   : > { %v1894_v13 = vadd.f32 %v1893_v12, %v1891_v10  ;;  %v2014_v10 = vld [vmem:[#allocation8 + $0x3b0] sm:$0xff]  ;;  %v2007_v12 = vld [vmem:[#allocation8 + $0x378] sm:$0xff] }
 0x52e   : > { %v4224_v14 = vmul.f32 0.25, %v1894_v13  ;;  %v2006_v13 = vld [vmem:[#allocation8 + $0x370] sm:$0xff] }
 0x530   : > { %2131 = vmatmul.mubr.f32.vlgmr.msra.gmra.mxu0 %v4224_v14  ;;  %2273 = vmatmul.mubr.f32.vlgmr.msra.gmra.mxu1 %v4224_v14 }
 0x531   : > { %2138 = vmatpush1.msra.mxu0 %v2018_v15  ;;  %2201 = vmatprep.mubr.f32.mxu0 %v3460_v11  ;;  %v1999_v15 = vld [vmem:[#allocation8 + $0x338] sm:$0xff] }
 0x532   : > { %2139 = vmatprep.subr.mxu0 %v2011_v16  ;;  %3010 = vmatpush3.msra.mxu1 %v2373_v17  ;;  %v1998_v16 = vld [vmem:[#allocation8 + $0x330] sm:$0xff]  ;;  %v1991_v17 = vld [vmem:[#allocation8 + $0x2f8] sm:$0xff] }
 0x533   : > { %2140 = vmatpush1.msra.mxu0 %v2010_v19  ;;  %3011 = vmatprep.subr.mxu1 %v2388_v20  ;;  %v1990_v19 = vld [vmem:[#allocation8 + $0x2f0] sm:$0xff]  ;;  %v1983_v20 = vld [vmem:[#allocation8 + $0x2b8] sm:$0xff] }
 0x534   : > { %2141 = vmatprep.subr.mxu0 %v2003_v22  ;;  %3012 = vmatpush3.msra.mxu1 %v2372_v23  ;;  %v1982_v22 = vld [vmem:[#allocation8 + $0x2b0] sm:$0xff]  ;;  %v1975_v23 = vld [vmem:[#allocation8 + $0x278] sm:$0xff] }
 0x535   : > { %2142 = vmatpush1.msra.mxu0 %v2002_v24  ;;  %3013 = vmatprep.subr.mxu1 %v2387_v26  ;;  %v1974_v24 = vld [vmem:[#allocation8 + $0x270] sm:$0xff] }
 0x536   : > { %2143 = vmatprep.subr.mxu0 %v1995_v59  ;;  %3014 = vmatpush3.msra.mxu1 %v2371_v27  ;;  %v1966_v26 = vld [vmem:[#allocation8 + $0x230] sm:$0xff]  ;;  %v1959_v59 = vld [vmem:[#allocation8 + $0x1f8] sm:$0xff] }
 0x537   : > { %2144 = vmatpush1.msra.mxu0 %v1994_v29  ;;  %3015 = vmatprep.subr.mxu1 %v2386_v31  ;;  %v1958_v27 = vld [vmem:[#allocation8 + $0x1f0] sm:$0xff]  ;;  %v1951_v29 = vld [vmem:[#allocation8 + $0x1b8] sm:$0xff] }
 0x538   : > { %2145 = vmatprep.subr.mxu0 %v1987_v32  ;;  %3016 = vmatpush3.msra.mxu1 %v2370_v33  ;;  %v1950_v31 = vld [vmem:[#allocation8 + $0x1b0] sm:$0xff]  ;;  %v1943_v32 = vld [vmem:[#allocation8 + $0x178] sm:$0xff] }
 0x539   : > { %2146 = vmatpush1.msra.mxu0 %v1986_v34  ;;  %3017 = vmatprep.subr.mxu1 %v2385_v35  ;;  %v1942_v33 = vld [vmem:[#allocation8 + $0x170] sm:$0xff]  ;;  %v1935_v34 = vld [vmem:[#allocation8 + $0x138] sm:$0xff] }
 0x53a   : > { %2147 = vmatprep.subr.mxu0 %v1979_v36  ;;  %3018 = vmatpush3.msra.mxu1 %v2369_v37  ;;  %v1934_v35 = vld [vmem:[#allocation8 + $0x130] sm:$0xff]  ;;  %v1927_v36 = vld [vmem:[#allocation8 + $0xf8] sm:$0xff] }
 0x53b   : > { %2148 = vmatpush1.msra.mxu0 %v1978_v38  ;;  %3019 = vmatprep.subr.mxu1 %v2384_v39  ;;  %v1926_v37 = vld [vmem:[#allocation8 + $0xf0] sm:$0xff]  ;;  %v1919_v38 = vld [vmem:[#allocation8 + $0xb8] sm:$0xff] }
 0x53c   : > { %2149 = vmatprep.subr.mxu0 %v1971_v41  ;;  %3020 = vmatpush3.msra.mxu1 %v2368_v43  ;;  %v1918_v39 = vld [vmem:[#allocation8 + $0xb0] sm:$0xff]  ;;  %v1911_v41 = vld [vmem:[#allocation8 + $0x78] sm:$0xff] }
 0x53d   : > { %2150 = vmatpush1.msra.mxu0 %v1970_v21  ;;  %3021 = vmatprep.subr.mxu1 %v2383_v44  ;;  %v1910_v43 = vld [vmem:[#allocation8 + $0x70] sm:$0xff]  ;;  %v1903_v21 = vld [vmem:[#allocation8 + $0x38] sm:$0xff] }
 0x53e   : > { %2151 = vmatprep.subr.mxu0 %v1963_v45  ;;  %3022 = vmatpush3.msra.mxu1 %v2367_v46  ;;  %v1902_v44 = vld [vmem:[#allocation8 + $0x30] sm:$0xff]  ;;  %v2361_v45 = vld [vmem:[#allocation11 + $0x18] sm:$0xff] }
 0x53f   : > { %2152 = vmatpush1.msra.mxu0 %v1962_v47  ;;  %3023 = vmatprep.subr.mxu1 %v2382_v28  ;;  %v2376_v46 = vld [vmem:[#allocation11 + $0x90] sm:$0xff]  ;;  %v2375_v28 = vld [vmem:[#allocation11 + $0x88] sm:$0xff] }
 0x540   : > { %2153 = vmatprep.subr.mxu0 %v1955_v48  ;;  %3024 = vmatpush3.msra.mxu1 %v2366_v49  ;;  %v2360_v47 = vld [vmem:[#allocation11 + $0x10] sm:$0xff]  ;;  %v2359_v48 = vld [vmem:[#allocation11 + $0x8] sm:$0xff]  ;;  %v2374_v49 = vld [vmem:[#allocation11 + $0x80] sm:$0xff] }
 0x541   : > { %2154 = vmatpush1.msra.mxu0 %v1954_v50  ;;  %3025 = vmatprep.subr.mxu1 %v2381_v30  ;;  %v2358_v50 = vld [vmem:[#allocation11] sm:$0xff]  ;;  %v2421_v30 = vld [vmem:[#allocation11 + $0x1f8] sm:$0xff] }
 0x542   : > { %2155 = vmatprep.subr.mxu0 %v1947_v51  ;;  %3026 = vmatpush3.msra.mxu1 %v2365_v53  ;;  %v2453_v51 = vld [vmem:[#allocation11 + $0x2f8] sm:$0xff] }
 0x543   : > { %2156 = vmatpush1.msra.mxu0 %v1946_v55  ;;  %3027 = vmatprep.subr.mxu1 %v2380_v56  ;;  %v2405_v53 = vld [vmem:[#allocation11 + $0x178] sm:$0xff]  ;;  %v2404_v55 = vld [vmem:[#allocation11 + $0x170] sm:$0xff]  ;;  %v2419_v56 = vld [vmem:[#allocation11 + $0x1e8] sm:$0xff] }
 0x544   : > { %2157 = vmatprep.subr.mxu0 %v1939_v57  ;;  %3028 = vmatpush3.msra.mxu1 %v2364_v58  ;;  %v2403_v57 = vld [vmem:[#allocation11 + $0x168] sm:$0xff]  ;;  %v2418_v58 = vld [vmem:[#allocation11 + $0x1e0] sm:$0xff] }
 0x545   : > { %2158 = vmatpush1.msra.mxu0 %v1938_v25  ;;  %3029 = vmatprep.subr.mxu1 %v2379_v60  ;;  %v2402_v25 = vld [vmem:[#allocation11 + $0x160] sm:$0xff]  ;;  %v2417_v60 = vld [vmem:[#allocation11 + $0x1d8] sm:$0xff] }
 0x546   : > { %2159 = vmatprep.subr.mxu0 %v1931_v61  ;;  %3030 = vmatpush3.msra.mxu1 %v2363_v40  ;;  %v2401_v61 = vld [vmem:[#allocation11 + $0x158] sm:$0xff]  ;;  %v2416_v40 = vld [vmem:[#allocation11 + $0x1d0] sm:$0xff] }
 0x547   : > { %2160 = vmatpush1.msra.mxu0 %v1930_v42  ;;  %3031 = vmatprep.subr.mxu1 %v2378_v62  ;;  %v2400_v42 = vld [vmem:[#allocation11 + $0x150] sm:$0xff]  ;;  %v2415_v62 = vld [vmem:[#allocation11 + $0x1c8] sm:$0xff] }
 0x548   : > { %2161 = vmatprep.subr.mxu0 %v1923_v63  ;;  %3032 = vmatpush3.msra.mxu1 %v2362_v0  ;;  %v2399_v63 = vld [vmem:[#allocation11 + $0x148] sm:$0xff]  ;;  %v2414_v0 = vld [vmem:[#allocation11 + $0x1c0] sm:$0xff] }
 0x549   : > { %2162 = vmatpush1.msra.mxu0 %v1922_v1  ;;  %3033 = vmatprep.subr.mxu1 %v2377_v2  ;;  %v2398_v1 = vld [vmem:[#allocation11 + $0x140] sm:$0xff]  ;;  %v2413_v2 = vld [vmem:[#allocation11 + $0x1b8] sm:$0xff] }
 0x54a   : > { %2163 = vmatprep.subr.mxu0 %v1915_v52  ;;  %3034 = vmatpush3.msra.mxu1 %v2361_v45  ;;  %v2397_v52 = vld [vmem:[#allocation11 + $0x138] sm:$0xff]  ;;  %v2450_v45 = vld [vmem:[#allocation11 + $0x2e0] sm:$0xff] }
 0x54b   : > { %2164 = vmatpush1.msra.mxu0 %v1914_v3  ;;  %3035 = vmatprep.subr.mxu1 %v2376_v46  ;;  %v2412_v3 = vld [vmem:[#allocation11 + $0x1b0] sm:$0xff]  ;;  %v2434_v46 = vld [vmem:[#allocation11 + $0x260] sm:$0xff] }
 0x54c   : > { %2165 = vmatprep.subr.mxu0 %v1907_v54  ;;  %3036 = vmatpush3.msra.mxu1 %v2360_v47  ;;  %v2396_v54 = vld [vmem:[#allocation11 + $0x130] sm:$0xff]  ;;  %v2449_v47 = vld [vmem:[#allocation11 + $0x2d8] sm:$0xff] }
 0x54d   : > { %2166 = vmatpush1.msra.mxu0 %v1906_v4  ;;  %3037 = vmatprep.subr.mxu1 %v2375_v28  ;;  %v2411_v4 = vld [vmem:[#allocation11 + $0x1a8] sm:$0xff]  ;;  %v2433_v28 = vld [vmem:[#allocation11 + $0x258] sm:$0xff] }
 0x54e   : > { %2167 = vmatprep.subr.mxu0 %v1899_v5  ;;  %3038 = vmatpush3.msra.mxu1 %v2359_v48  ;;  %v2395_v5 = vld [vmem:[#allocation11 + $0x128] sm:$0xff]  ;;  %v2448_v48 = vld [vmem:[#allocation11 + $0x2d0] sm:$0xff] }
 0x54f   : > { %2168 = vmatpush1.msra.mxu0 %v1898_v6  ;;  %3039 = vmatprep.subr.mxu1 %v2374_v49  ;;  %v2410_v6 = vld [vmem:[#allocation11 + $0x1a0] sm:$0xff]  ;;  %v2432_v49 = vld [vmem:[#allocation11 + $0x250] sm:$0xff] }
 0x550   : > { %2202 = vmatmul.mubr.f32.vlgmr.msra.gmra.mxu0 %v4224_v14  ;;  %2279 = vmatprep.subr.mxu0 %v2023_v7  ;;  %v2394_v7 = vld [vmem:[#allocation11 + $0x120] sm:$0xff] }
 0x551   : > { %2280 = vmatpush1.msra.mxu0 %v2022_v8  ;;  %2343 = vmatprep.mubr.f32.mxu0 %v3460_v11  ;;  %v1967_v11 = vld [vmem:[#allocation8 + $0x238] sm:$0xff] }
 0x552   : > { %2281 = vmatprep.subr.mxu0 %v2015_v9  ;;  %3040 = vmatpush3.msra.mxu1 %v2358_v50  ;;  %v2409_v8 = vld [vmem:[#allocation11 + $0x198] sm:$0xff]  ;;  %v2447_v50 = vld [vmem:[#allocation11 + $0x2c8] sm:$0xff] }
 0x553   : > { %2282 = vmatpush1.msra.mxu0 %v2014_v10  ;;  %3079 = vmatprep.subr.mxu1 %v2453_v51  ;;  %v2393_v9 = vld [vmem:[#allocation11 + $0x118] sm:$0xff]  ;;  %v2408_v10 = vld [vmem:[#allocation11 + $0x190] sm:$0xff]  ;;  %v2446_v51 = vld [vmem:[#allocation11 + $0x2c0] sm:$0xff] }
 0x554   : > { %2283 = vmatprep.subr.mxu0 %v2007_v12  ;;  %v2392_v12 = vld [vmem:[#allocation11 + $0x110] sm:$0xff] }
 0x555   : > { %2284 = vmatpush1.msra.mxu0 %v2006_v13  ;;  %v2407_v13 = vld [vmem:[#allocation11 + $0x188] sm:$0xff] }
 0x556   : > { %2285 = vmatprep.subr.mxu0 %v1999_v15  ;;  %v2391_v15 = vld [vmem:[#allocation11 + $0x108] sm:$0xff] }
 0x557   : > { %2286 = vmatpush1.msra.mxu0 %v1998_v16  ;;  %v2406_v16 = vld [vmem:[#allocation11 + $0x180] sm:$0xff] }
 0x558   : > { %2287 = vmatprep.subr.mxu0 %v1991_v17  ;;  %v2390_v17 = vld [vmem:[#allocation11 + $0x100] sm:$0xff] }
 0x559   : > { %2288 = vmatpush1.msra.mxu0 %v1990_v19  ;;  %v2485_v19 = vld [vmem:[#allocation11 + $0x3f8] sm:$0xff] }
 0x55a   : > { %2289 = vmatprep.subr.mxu0 %v1983_v20  ;;  %v2028_v20 = vsub.s32 0, %v3774_v18 }
 0x55b   : > { %2290 = vmatpush1.msra.mxu0 %v1982_v22  ;;  %v4236_v22 = vld [vmem:[%s4303_s10] sm:$0xff] }
 0x55c   : > { %2291 = vmatprep.subr.mxu0 %v1975_v23  ;;  %v2032_v23 = vsub.s32 1, %v3774_v18 }
 0x55d   : > { %2292 = vmatpush1.msra.mxu0 %v1974_v24  ;;  %v2048_v24 = vsub.s32 5, %v3774_v18 }
 0x55e   : > { %2293 = vmatprep.subr.mxu0 %v1967_v11  ;;  %v2029_v11 = vrot.slane %v4236_v22, %v2028_v20  ;;  %v2484_v20 = vld [vmem:[#allocation11 + $0x3f0] sm:$0xff] }
 0x55f   : > { %2294 = vmatpush1.msra.mxu0 %v1966_v26  ;;  %v2033_v26 = vrot.slane %v4236_v22, %v2032_v23  ;;  %v2468_v23 = vld [vmem:[#allocation11 + $0x370] sm:$0xff] }
 0x560   : > { %2295 = vmatprep.subr.mxu0 %v1959_v59  ;;  %v2049_v59 = vrot.slane %v4236_v22, %v2048_v24  ;;  %v2483_v24 = vld [vmem:[#allocation11 + $0x3e8] sm:$0xff] }
 0x561   : > { %2296 = vmatpush1.msra.mxu0 %v1958_v27 }
 0x562   : > { %2297 = vmatprep.subr.mxu0 %v1951_v29 }
 0x563   : > { %2298 = vmatpush1.msra.mxu0 %v1950_v31 }
 0x564   : > { %2299 = vmatprep.subr.mxu0 %v1943_v32 }
 0x565   : > { %2300 = vmatpush1.msra.mxu0 %v1942_v33 }
 0x566   : > { %2301 = vmatprep.subr.mxu0 %v1935_v34 }
 0x567   : > { %2302 = vmatpush1.msra.mxu0 %v1934_v35 }
 0x568   : > { %2303 = vmatprep.subr.mxu0 %v1927_v36 }
 0x569   : > { %2304 = vmatpush1.msra.mxu0 %v1926_v37 }
 0x56a   : > { %2305 = vmatprep.subr.mxu0 %v1919_v38  ;;  %v2437_v38 = vld [vmem:[#allocation11 + $0x278] sm:$0xff] }
 0x56b   : > { %2306 = vmatpush1.msra.mxu0 %v1918_v39 }
 0x56c   : > { %2307 = vmatprep.subr.mxu0 %v1911_v41  ;;  %v2452_v41 = vld [vmem:[#allocation11 + $0x2f0] sm:$0xff] }
 0x56d   : > { %2308 = vmatpush1.msra.mxu0 %v1910_v43  ;;  %v2436_v43 = vld [vmem:[#allocation11 + $0x270] sm:$0xff] }
 0x56e   : > { %2309 = vmatprep.subr.mxu0 %v1903_v21  ;;  %v2451_v21 = vld [vmem:[#allocation11 + $0x2e8] sm:$0xff] }
 0x56f   : > { %2310 = vmatpush1.msra.mxu0 %v1902_v44  ;;  %v2435_v44 = vld [vmem:[#allocation11 + $0x268] sm:$0xff] }
 0x570   : > { %2344 = vmatmul.mubr.f32.vlgmr.msra.gmra.mxu0 %v4224_v14  ;;  %3044 = vmatprep.subr.mxu0 %v2421_v30  ;;  %v2420_v14 = vld [vmem:[#allocation11 + $0x1f0] sm:$0xff]  ;;  %v2431_v30 = vld [vmem:[#allocation11 + $0x248] sm:$0xff] }
 0x571   : > { %3045 = vmatpush3.msra.mxu0 %v2405_v53  ;;  %v2430_v53 = vld [vmem:[#allocation11 + $0x240] sm:$0xff] }
 0x572   : > { %3046 = vmatprep.subr.mxu0 %v2420_v14  ;;  %v2445_v14 = vld [vmem:[#allocation11 + $0x2b8] sm:$0xff] }
 0x573   : > { %3047 = vmatpush3.msra.mxu0 %v2404_v55  ;;  %v2429_v55 = vld [vmem:[#allocation11 + $0x238] sm:$0xff] }
 0x574   : > { %3048 = vmatprep.subr.mxu0 %v2419_v56  ;;  %v2444_v56 = vld [vmem:[#allocation11 + $0x2b0] sm:$0xff] }
 0x575   : > { %3049 = vmatpush3.msra.mxu0 %v2403_v57  ;;  %v2428_v57 = vld [vmem:[#allocation11 + $0x230] sm:$0xff] }
 0x576   : > { %3050 = vmatprep.subr.mxu0 %v2418_v58  ;;  %v2443_v58 = vld [vmem:[#allocation11 + $0x2a8] sm:$0xff] }
 0x577   : > { %3051 = vmatpush3.msra.mxu0 %v2402_v25  ;;  %v2044_v25 = vsub.s32 4, %v3774_v18 }
 0x578   : > { %3052 = vmatprep.subr.mxu0 %v2417_v60  ;;  %v2427_v60 = vld [vmem:[#allocation11 + $0x228] sm:$0xff] }
 0x579   : > { %3053 = vmatpush3.msra.mxu0 %v2401_v61  ;;  %v2036_v61 = vsub.s32 2, %v3774_v18 }
 0x57a   : > { %3054 = vmatprep.subr.mxu0 %v2416_v40  ;;  %v2442_v40 = vld [vmem:[#allocation11 + $0x2a0] sm:$0xff] }
 0x57b   : > { %3055 = vmatpush3.msra.mxu0 %v2400_v42  ;;  %v2040_v42 = vsub.s32 3, %v3774_v18 }
 0x57c   : > { %3056 = vmatprep.subr.mxu0 %v2415_v62  ;;  %v2426_v62 = vld [vmem:[#allocation11 + $0x220] sm:$0xff] }
 0x57d   : > { %3057 = vmatpush3.msra.mxu0 %v2399_v63  ;;  %v2441_v63 = vld [vmem:[#allocation11 + $0x298] sm:$0xff] }
 0x57e   : > { %3058 = vmatprep.subr.mxu0 %v2414_v0  ;;  %v2045_v0 = vrot.slane %v4236_v22, %v2044_v25  ;;  %v2454_v25 = vld [vmem:[#allocation11 + $0x300] sm:$0xff] }
 0x57f   : > { %3059 = vmatpush3.msra.mxu0 %v2398_v1  ;;  %v2037_v1 = vrot.slane %v4236_v22, %v2036_v61 }
 0x580   : > { %3060 = vmatprep.subr.mxu0 %v2413_v2  ;;  %v2425_v2 = vld [vmem:[#allocation11 + $0x218] sm:$0xff] }
 0x581   : > { %3061 = vmatpush3.msra.mxu0 %v2397_v52  ;;  %v2041_v52 = vrot.slane %v4236_v22, %v2040_v42 }
 0x582   : > { %3062 = vmatprep.subr.mxu0 %v2412_v3  ;;  %v2440_v3 = vld [vmem:[#allocation11 + $0x290] sm:$0xff] }
 0x583   : > { %3063 = vmatpush3.msra.mxu0 %v2396_v54 }
 0x584   : > { %3064 = vmatprep.subr.mxu0 %v2411_v4  ;;  %v2424_v4 = vld [vmem:[#allocation11 + $0x210] sm:$0xff] }
 0x585   : > { %3065 = vmatpush3.msra.mxu0 %v2395_v5  ;;  %v2439_v5 = vld [vmem:[#allocation11 + $0x288] sm:$0xff] }
 0x586   : > { %3066 = vmatprep.subr.mxu0 %v2410_v6 }
 0x587   : > { %3067 = vmatpush3.msra.mxu0 %v2394_v7 }
 0x588   : > { %3068 = vmatprep.subr.mxu0 %v2409_v8 }
 0x589   : > { %3069 = vmatpush3.msra.mxu0 %v2393_v9  ;;  %v2423_v9 = vld [vmem:[#allocation11 + $0x208] sm:$0xff] }
 0x58a   : > { %3070 = vmatprep.subr.mxu0 %v2408_v10 }
 0x58b   : > { %3071 = vmatpush3.msra.mxu0 %v2392_v12  ;;  %v2438_v12 = vld [vmem:[#allocation11 + $0x280] sm:$0xff] }
 0x58c   : > { %3072 = vmatprep.subr.mxu0 %v2407_v13  ;;  %v2422_v13 = vld [vmem:[#allocation11 + $0x200] sm:$0xff] }
 0x58d   : > { %3073 = vmatpush3.msra.mxu0 %v2391_v15 }
 0x58e   : > { %3074 = vmatprep.subr.mxu0 %v2406_v16 }
 0x58f   : > { %3075 = vmatpush3.msra.mxu0 %v2390_v17 }
 0x590   : > { %3114 = vmatprep.subr.mxu0 %v2485_v19  ;;  %v2469_v19 = vld [vmem:[#allocation11 + $0x378] sm:$0xff] }
 0x5f0   : > { %v2132_v27 = vpop.f32.mrf.mxu0  ;;  %v4243_v29 = vpop.f32.mrf.mxu1 }
 0x5f1   : > { %v2133_v31 = vadd.f32 %v2132_v27, %v2029_v11  ;;  %v2275_v6 = vadd.f32 %v4243_v29, %v2045_v0  ;;  %v2467_v11 = vld [vmem:[#allocation11 + $0x368] sm:$0xff]  ;;  %v2481_v27 = vld [vmem:[#allocation11 + $0x3d8] sm:$0xff]  ;;  %v2937_v0 = vld [vmem:[%s4305_s12] ss:$0 sm:$0xff] }
 0x5f2   : > { %v2134_v32 = vpop.f32.mrf.mxu0  ;;  %v2276_v33 = vpop.f32.mrf.mxu1  ;;  %v2465_v29 = vld [vmem:[#allocation11 + $0x358] sm:$0xff] }
 0x5f3   : > { %v2135_v34 = vadd.f32 %v2134_v32, %v2033_v26  ;;  %v2277_v35 = vadd.f32 %v2276_v33, %v2049_v59  ;;  %v2350_v37 = vmax.f32 %v2133_v31, 0.0  ;;  %v2354_v16 = vmax.f32 %v2275_v6, 0.0  ;;  %v2482_v26 = vld [vmem:[#allocation11 + $0x3e0] sm:$0xff]  ;;  %v2480_v31 = vld [vmem:[#allocation11 + $0x3d0] sm:$0xff]  ;;  %v2479_v33 = vld [vmem:[#allocation11 + $0x3c8] sm:$0xff] }
 0x5f4   : > { %v2466_v59 = vld [vmem:[#allocation11 + $0x360] sm:$0xff]  ;;  %v2464_v32 = vld [vmem:[#allocation11 + $0x350] sm:$0xff] }
 0x5f5   : > { %v2351_v36 = vmax.f32 %v2135_v34, 0.0  ;;  %v2355_v39 = vmax.f32 %v2277_v35, 0.0  ;;  %v2463_v34 = vld [vmem:[#allocation11 + $0x348] sm:$0xff]  ;;  %v2478_v35 = vld [vmem:[#allocation11 + $0x3c0] sm:$0xff] }
 0x5f7   : > { %2557 = vmatprep.mubr.f32.mxu1 %v2351_v36  ;;  %v2462_v36 = vld [vmem:[#allocation11 + $0x340] sm:$0xff] }
 0x5f8   : > { %2558 = vmatmul.mubr.f32.vlgmr.msra.gmra.mxu1 %v2350_v37  ;;  %v2477_v37 = vld [vmem:[#allocation11 + $0x3b8] sm:$0xff] }
 0x5f9   : > { %3080 = vmatpush3.msra.mxu1 %v2437_v38  ;;  %2697 = vmatprep.mubr.f32.mxu1 %v2355_v39  ;;  %v2461_v38 = vld [vmem:[#allocation11 + $0x338] sm:$0xff]  ;;  %v2476_v39 = vld [vmem:[#allocation11 + $0x3b0] sm:$0xff] }
 0x5fa   : > { %3081 = vmatprep.subr.mxu1 %v2452_v41  ;;  %v2460_v41 = vld [vmem:[#allocation11 + $0x330] sm:$0xff] }
 0x5fb   : > { %3082 = vmatpush3.msra.mxu1 %v2436_v43  ;;  %v2475_v43 = vld [vmem:[#allocation11 + $0x3a8] sm:$0xff] }
 0x5fc   : > { %3083 = vmatprep.subr.mxu1 %v2451_v21  ;;  %v2459_v21 = vld [vmem:[#allocation11 + $0x328] sm:$0xff] }
 0x5fd   : > { %3084 = vmatpush3.msra.mxu1 %v2435_v44  ;;  %v2052_v44 = vsub.s32 6, %v3774_v18 }
 0x5fe   : > { %3085 = vmatprep.subr.mxu1 %v2450_v45  ;;  %v2474_v45 = vld [vmem:[#allocation11 + $0x3a0] sm:$0xff] }
 0x5ff   : > { %3086 = vmatpush3.msra.mxu1 %v2434_v46  ;;  %v2056_v46 = vsub.s32 7, %v3774_v18  ;;  %v2455_v18 = vld [vmem:[#allocation11 + $0x308] sm:$0xff] }
 0x600   : > { %3087 = vmatprep.subr.mxu1 %v2449_v47  ;;  %v2458_v47 = vld [vmem:[#allocation11 + $0x320] sm:$0xff] }
 0x601   : > { %3088 = vmatpush3.msra.mxu1 %v2433_v28  ;;  %v2473_v28 = vld [vmem:[#allocation11 + $0x398] sm:$0xff] }
 0x602   : > { %3089 = vmatprep.subr.mxu1 %v2448_v48  ;;  %v2053_v48 = vrot.slane %v4236_v22, %v2052_v44 }
 0x603   : > { %3090 = vmatpush3.msra.mxu1 %v2432_v49  ;;  %v2457_v49 = vld [vmem:[#allocation11 + $0x318] sm:$0xff] }
 0x604   : > { %3091 = vmatprep.subr.mxu1 %v2447_v50  ;;  %v2057_v50 = vrot.slane %v4236_v22, %v2056_v46 }
 0x605   : > { %3092 = vmatpush3.msra.mxu1 %v2431_v30  ;;  %v2472_v30 = vld [vmem:[#allocation11 + $0x390] sm:$0xff] }
 0x606   : > { %3093 = vmatprep.subr.mxu1 %v2446_v51 }
 0x607   : > { %3094 = vmatpush3.msra.mxu1 %v2430_v53  ;;  %v2456_v53 = vld [vmem:[#allocation11 + $0x310] sm:$0xff] }
 0x608   : > { %3095 = vmatprep.subr.mxu1 %v2445_v14  ;;  %v2471_v14 = vld [vmem:[#allocation11 + $0x388] sm:$0xff] }
 0x609   : > { %3096 = vmatpush3.msra.mxu1 %v2429_v55 }
 0x60a   : > { %3097 = vmatprep.subr.mxu1 %v2444_v56 }
 0x60b   : > { %3098 = vmatpush3.msra.mxu1 %v2428_v57 }
 0x60c   : > { %3099 = vmatprep.subr.mxu1 %v2443_v58  ;;  %v2470_v58 = vld [vmem:[#allocation11 + $0x380] sm:$0xff] }
 0x60d   : > { %3100 = vmatpush3.msra.mxu1 %v2427_v60 }
 0x60e   : > { %3101 = vmatprep.subr.mxu1 %v2442_v40 }
 0x60f   : > { %3102 = vmatpush3.msra.mxu1 %v2426_v62 }
 0x610   : > { %v2203_v54 = vpop.f32.mrf.mxu0  ;;  %3103 = vmatprep.subr.mxu1 %v2441_v63 }
 0x611   : > { %3104 = vmatpush3.msra.mxu1 %v2425_v2  ;;  %v2204_v7 = vadd.f32 %v2203_v54, %v2037_v1 }
 0x612   : > { %v2205_v8 = vpop.f32.mrf.mxu0  ;;  %3105 = vmatprep.subr.mxu1 %v2440_v3 }
 0x613   : > { %v2206_v10 = vadd.f32 %v2205_v8, %v2041_v52  ;;  %3106 = vmatpush3.msra.mxu1 %v2424_v4  ;;  %v2352_v17 = vmax.f32 %v2204_v7, 0.0 }
 0x614   : > { %3107 = vmatprep.subr.mxu1 %v2439_v5 }
 0x615   : > { %v2353_v15 = vmax.f32 %v2206_v10, 0.0  ;;  %3108 = vmatpush3.msra.mxu1 %v2423_v9 }
 0x616   : > { %3109 = vmatprep.subr.mxu1 %v2438_v12 }
 0x617   : > { %2627 = vmatprep.mubr.f32.mxu0 %v2353_v15  ;;  %3110 = vmatpush3.msra.mxu1 %v2422_v13 }
 0x618   : > { %2628 = vmatmul.mubr.f32.vlgmr.msra.gmra.mxu0 %v2352_v17  ;;  %2698 = vmatmul.mubr.f32.vlgmr.msra.gmra.mxu1 %v2354_v16 }
 0x619   : > { %3115 = vmatpush3.msra.mxu0 %v2469_v19 }
 0x61a   : > { %3116 = vmatprep.subr.mxu0 %v2484_v20 }
 0x61b   : > { %3117 = vmatpush3.msra.mxu0 %v2468_v23 }
 0x61c   : > { %3118 = vmatprep.subr.mxu0 %v2483_v24 }
 0x61d   : > { %3119 = vmatpush3.msra.mxu0 %v2467_v11 }
 0x61e   : > { %3120 = vmatprep.subr.mxu0 %v2482_v26 }
 0x61f   : > { %3121 = vmatpush3.msra.mxu0 %v2466_v59 }
 0x620   : > { %3122 = vmatprep.subr.mxu0 %v2481_v27 }
 0x621   : > { %3123 = vmatpush3.msra.mxu0 %v2465_v29 }
 0x622   : > { %3124 = vmatprep.subr.mxu0 %v2480_v31 }
 0x623   : > { %3125 = vmatpush3.msra.mxu0 %v2464_v32 }
 0x624   : > { %3126 = vmatprep.subr.mxu0 %v2479_v33 }
 0x625   : > { %3127 = vmatpush3.msra.mxu0 %v2463_v34 }
 0x626   : > { %3128 = vmatprep.subr.mxu0 %v2478_v35 }
 0x627   : > { %3129 = vmatpush3.msra.mxu0 %v2462_v36 }
 0x628   : > { %3130 = vmatprep.subr.mxu0 %v2477_v37 }
 0x629   : > { %3131 = vmatpush3.msra.mxu0 %v2461_v38 }
 0x62a   : > { %3132 = vmatprep.subr.mxu0 %v2476_v39 }
 0x62b   : > { %3133 = vmatpush3.msra.mxu0 %v2460_v41 }
 0x62c   : > { %3134 = vmatprep.subr.mxu0 %v2475_v43 }
 0x62d   : > { %3135 = vmatpush3.msra.mxu0 %v2459_v21 }
 0x62e   : > { %3136 = vmatprep.subr.mxu0 %v2474_v45 }
 0x62f   : > { %3137 = vmatpush3.msra.mxu0 %v2458_v47 }
 0x630   : > { %v2345_v51 = vpop.f32.mrf.mxu0  ;;  %3138 = vmatprep.subr.mxu0 %v2473_v28 }
 0x631   : > { %3139 = vmatpush3.msra.mxu0 %v2457_v49  ;;  %v2346_v55 = vadd.f32 %v2345_v51, %v2053_v48 }
 0x632   : > { %v2347_v56 = vpop.f32.mrf.mxu0  ;;  %3140 = vmatprep.subr.mxu0 %v2472_v30 }
 0x633   : > { %v2348_v57 = vadd.f32 %v2347_v56, %v2057_v50  ;;  %3141 = vmatpush3.msra.mxu0 %v2456_v53  ;;  %v2356_v61 = vmax.f32 %v2346_v55, 0.0 }
 0x634   : > { %3142 = vmatprep.subr.mxu0 %v2471_v14 }
 0x635   : > { %v2357_v60 = vmax.f32 %v2348_v57, 0.0  ;;  %3143 = vmatpush3.msra.mxu0 %v2455_v18 }
 0x636   : > { %3144 = vmatprep.subr.mxu0 %v2470_v58 }
 0x637   : > { %3145 = vmatpush3.msra.mxu0 %v2454_v25  ;;  %2767 = vmatprep.mubr.f32.mxu0 %v2357_v60 }
 0x638   : > { %2768 = vmatmul.mubr.f32.vlgmr.msra.gmra.mxu0 %v2356_v61 }
 0x6b8   : > { %v3041_v22 = vpop.f32.mrf.mxu1 }
 0x6ba   : > { %v3042_v42 = vpop.f32.mrf.mxu1 }
 0x6bb   : > { %v3043_v63 = vadd.f32 %v3042_v42, %v3041_v22 }
 0x6bd   : > { %v2560_v52 = vadd.f32 %v3043_v63, %v2937_v0 }
 0x6d8   : > { %v3076_v40 = vpop.f32.mrf.mxu0  ;;  %v3111_v1 = vpop.f32.mrf.mxu1 }
 0x6da   : > { %v3077_v62 = vpop.f32.mrf.mxu0  ;;  %v3112_v3 = vpop.f32.mrf.mxu1 }
 0x6db   : > { %v3078_v2 = vadd.f32 %v3077_v62, %v3076_v40  ;;  %v3113_v5 = vadd.f32 %v3112_v3, %v3111_v1 }
 0x6dd   : > { %v2630_v54 = vadd.f32 %v3078_v2, %v2560_v52 }
 0x6df   : > { %v2700_v7 = vadd.f32 %v3113_v5, %v2630_v54 }
 0x6f8   : > { %v3146_v4 = vpop.f32.mrf.mxu0 }
 0x6fa   : > { %v3147_v6 = vpop.f32.mrf.mxu0 }
 0x6fb   : > { %v3148_v8 = vadd.f32 %v3147_v6, %v3146_v4 }
 0x6fd   : > { %v2770_v9 = vadd.f32 %v3148_v8, %v2700_v7 }
 0x6ff   : > { %2773 = vst [vmem:[%s464_s14] sm:$0xff] %v2770_v9 }
 0x700   : > { %3395 = shalt.err (!%p3392_p3)
}
 0x701   : > { %s3396_s15 = scalar_lea.hbm %s2786_s21, 128  ;;  %s3400_s25 = scalar_lea.hbm %s4306_s13, 384 }
 0x702   : > { %p3397_p2 = scmp.ne.s32.totalorder %s2786_s21, %s3396_s15  ;;  %p3401_p6 = scmp.lt.s32.totalorder %s2786_s21, %s4306_s13 }
 0x703   : > { %p3402_p9 = scmp.lt.s32.totalorder %s3400_s25, %s3396_s15 }
 0x704   : > { %p3398_p4 = pnand %p3397_p2, %p3570_p5 }
 0x705   : > { %p3403_p7 = por %p3402_p9, %p3401_p6 }
 0x706   : > { %p3399_p13 = pneg %p3398_p4 }
 0x708   : > { %p3404_p10 = pnand %p3403_p7, %p3399_p13 }
 0x70a   : > { %3407 = shalt.err (!%p3404_p10)
}
 0x70b   : > { %3271 = dma.vmem_to_hbm [thread:$0]  (%p3570_p5), %s2789_s17, 128, %s2786_s21, %s2775_s20  }
 0x70c PF: > { %s4332_s19 = sld [smem:[#allocation17_spill]]  ;;  %p3288_p12 = scmp.ge.s32.totalorder %s3450_s28, 2 }
 0x70d   : > { %s4333_s22 = sld [smem:[#allocation21_spill]] }
 0x712   : > { %s2800_s30 = sand.u32 1, %s4332_s19  }
 0x713   : > { %p4334_p8 = scmp.ne.s32.totalorder %s4333_s22, 0  ;;  %s2801_s24 = scalar_lea.sflag [#allocation10], %s2800_s30 }
 0x715   : > { %p3281_p11 = pnand %p3288_p12, %p4334_p8 }
 0x717   : > { %p3282_p0 = pneg %p3281_p11 }
 0x719   : > { %3433 = dma.done.wait (%p3282_p0), %s2801_s24, 128  }
 0x71a   : > { %3435 = vsyncadd (%p3282_p0), %s2801_s24, 4294967168  ;;  %s4335_s28 = sld [smem:[#allocation19_spill]]  ;;  %s4338_s25 = smov %s3442_s26 }
 0x71b   : > { %s4336_s29 = sld [smem:[#allocation18_spill]] }
 0x71c   : > { %s4337_s27 = sld [smem:[#allocation20_spill]] }
 0x720   : > { %p25_p1 = scmp.ge.s32.totalorder %s4335_s28, 5  }
 0x721   : > { %s4339_s26 = smov %s4336_s29 }
 0x722   :  { %27 = sbr.rel (!%p25_p1) target bundleno = 5 (0x5), region = 141 }
 0x727   :  { %2806 = vsyncpa [#allocation9], 1 }
 0x728   :  { %2808 = vsyncpa [#allocation9 + $0x1], 1 }
 0x729   :  { %2809 = vsyncpa [#allocation12], 1 }
 0x72a   :  { %2810 = vsyncpa [#allocation10], 1 }
 0x72b   :  { %2812 = vsyncpa [#allocation10 + $0x1], 1 }

</bundles_post_ra>
